<compile_context>
chip_gen: v7x
topology: tpu7x:2x2x1
jax: 0.10.0
libtpu: 0.0.40
codegen_flags: <defaults>
</compile_context>

<pallas_src>
import math
from functools import partial

import jax
import jax.numpy as jnp
from jax.experimental import pallas as pl
from jax.experimental.pallas import tpu as pltpu

VMEM_LIMIT = 64 * 1024 * 1024


def _row_tile(n, cap=256):
    """Largest power-of-two row tile (<= cap) dividing n, else n itself."""
    for t in (512, 256, 128, 64, 32, 16, 8):
        if t <= cap and n % t == 0:
            return t
    return n


def _col_tile(m, cap=512):
    """Largest multiple-of-128 column tile (<= cap) dividing m, else full m."""
    if m <= cap:
        return m
    t = (cap // 128) * 128
    while t >= 128:
        if m % t == 0:
            return t
        t -= 128
    return m


# ----------------------------- Pallas kernels -----------------------------

def _ln_matmul_kernel(x_ref, g_ref, b_ref, w_ref, o_ref, xln_sc):
    # LayerNorm (f32 stats) computed once per row tile; projection column-tiled.
    @pl.when(pl.program_id(1) == 0)
    def _():
        x = x_ref[...]
        mu = jnp.mean(x, axis=-1, keepdims=True)
        xc = x - mu
        var = jnp.mean(xc * xc, axis=-1, keepdims=True)
        xln = xc * jax.lax.rsqrt(var + 1e-5) * g_ref[...] + b_ref[...]
        xln_sc[...] = xln.astype(jnp.bfloat16)

    o_ref[...] = jnp.dot(xln_sc[...], w_ref[...],
                         preferred_element_type=jnp.float32).astype(o_ref.dtype)


def ln_matmul(x2d, gamma, beta, w, out_dtype=jnp.bfloat16):
    N, C = x2d.shape
    M = w.shape[1]
    tn = _row_tile(N)
    tm = _col_tile(M)
    return pl.pallas_call(
        _ln_matmul_kernel,
        out_shape=jax.ShapeDtypeStruct((N, M), out_dtype),
        grid=(N // tn, M // tm),
        in_specs=[
            pl.BlockSpec((tn, C), lambda i, j: (i, 0)),
            pl.BlockSpec((1, C), lambda i, j: (0, 0)),
            pl.BlockSpec((1, C), lambda i, j: (0, 0)),
            pl.BlockSpec((C, tm), lambda i, j: (0, j)),
        ],
        out_specs=pl.BlockSpec((tn, tm), lambda i, j: (i, j)),
        scratch_shapes=[pltpu.VMEM((tn, C), jnp.bfloat16)],
        compiler_params=pltpu.CompilerParams(
            dimension_semantics=("parallel", "arbitrary"),
            vmem_limit_bytes=VMEM_LIMIT),
    )(x2d, gamma.reshape(1, C), beta.reshape(1, C), w)


def _ln_router_kernel(x_ref, g_ref, b_ref, wr_ref, br_ref, xln_ref, logit_ref):
    # Fused LayerNorm + combined router/noise projection (bf16 MXU, f32 logits).
    x = x_ref[...]
    mu = jnp.mean(x, axis=-1, keepdims=True)
    xc = x - mu
    var = jnp.mean(xc * xc, axis=-1, keepdims=True)
    xln = xc * jax.lax.rsqrt(var + 1e-5) * g_ref[...] + b_ref[...]
    xln_bf = xln.astype(jnp.bfloat16)
    xln_ref[...] = xln_bf
    logit_ref[...] = (jnp.dot(xln_bf, wr_ref[...], preferred_element_type=jnp.float32)
                      + br_ref[...])


def ln_router(x2d, gamma, beta, w_router, b_router):
    N, C = x2d.shape
    M = w_router.shape[1]           # 2 * num_experts (tiny)
    tn = _row_tile(N)
    return pl.pallas_call(
        _ln_router_kernel,
        out_shape=(jax.ShapeDtypeStruct((N, C), jnp.bfloat16),
                   jax.ShapeDtypeStruct((N, M), jnp.float32)),
        grid=(N // tn,),
        in_specs=[
            pl.BlockSpec((tn, C), lambda i: (i, 0)),
            pl.BlockSpec((1, C), lambda i: (0, 0)),
            pl.BlockSpec((1, C), lambda i: (0, 0)),
            pl.BlockSpec((C, M), lambda i: (0, 0)),
            pl.BlockSpec((1, M), lambda i: (0, 0)),
        ],
        out_specs=(pl.BlockSpec((tn, C), lambda i: (i, 0)),
                   pl.BlockSpec((tn, M), lambda i: (i, 0))),
        compiler_params=pltpu.CompilerParams(
            dimension_semantics=("parallel",),
            vmem_limit_bytes=VMEM_LIMIT),
    )(x2d, gamma.reshape(1, C), beta.reshape(1, C), w_router, b_router.reshape(1, M))


def _matmul_residual_kernel(a_ref, w_ref, r_ref, o_ref):
    # out = residual + a @ w  (fused out-projection + residual add), column-tiled.
    o_ref[...] = r_ref[...] + jnp.dot(a_ref[...], w_ref[...],
                                      preferred_element_type=jnp.float32)


def matmul_residual(a2d, w, residual2d):
    N, C = a2d.shape
    M = w.shape[1]
    tn = _row_tile(N)
    tm = _col_tile(M)
    return pl.pallas_call(
        _matmul_residual_kernel,
        out_shape=jax.ShapeDtypeStruct((N, M), jnp.float32),
        grid=(N // tn, M // tm),
        in_specs=[
            pl.BlockSpec((tn, C), lambda i, j: (i, 0)),
            pl.BlockSpec((C, tm), lambda i, j: (0, j)),
            pl.BlockSpec((tn, tm), lambda i, j: (i, j)),
        ],
        out_specs=pl.BlockSpec((tn, tm), lambda i, j: (i, j)),
        compiler_params=pltpu.CompilerParams(
            dimension_semantics=("parallel", "parallel"),
            vmem_limit_bytes=VMEM_LIMIT),
    )(a2d, w, residual2d)


def _flash_kernel(scale, q_ref, k_ref, v_ref, o_ref, q_sc, m_sc, l_sc, acc_sc):
    # Non-causal flash attention with online softmax; q/k/v come from one packed
    # (B, 3, H, T, hs) bf16 buffer.  Softmax scale applied once per q tile.
    ki = pl.program_id(3)

    @pl.when(ki == 0)
    def _():
        q_sc[...] = (q_ref[0, 0, 0, :, :] * scale).astype(jnp.bfloat16)
        m_sc[...] = jnp.full_like(m_sc, -jnp.inf)
        l_sc[...] = jnp.zeros_like(l_sc)
        acc_sc[...] = jnp.zeros_like(acc_sc)

    k = k_ref[0, 0, 0, :, :]
    v = v_ref[0, 0, 0, :, :]
    s = jax.lax.dot_general(q_sc[...], k, (((1,), (1,)), ((), ())),
                            preferred_element_type=jnp.float32)        # (tq, tk)
    m_prev = m_sc[...]
    m_new = jnp.maximum(m_prev, jnp.max(s, axis=-1, keepdims=True))
    alpha = jnp.exp(m_prev - m_new)
    p = jnp.exp(s - m_new)
    l_sc[...] = alpha * l_sc[...] + jnp.sum(p, axis=-1, keepdims=True)
    acc_sc[...] = alpha * acc_sc[...] + jnp.dot(p.astype(jnp.bfloat16), v,
                                                preferred_element_type=jnp.float32)
    m_sc[...] = m_new

    @pl.when(ki == pl.num_programs(3) - 1)
    def _():
        inv_l = pl.reciprocal(l_sc[...], approx=True)     # EUP, frees the VPU
        o_ref[0, 0, :, :] = (acc_sc[...] * inv_l).astype(o_ref.dtype)


def flash_attention(qkv_t, scale):
    # qkv_t: (B, 3, H, T, hs) bf16 packed q/k/v.  Output (B, H, T, hs) bf16 so the
    # downstream flatten to (B*T, C) is a free reshape.
    B, _, H, T, hs = qkv_t.shape
    tq = _row_tile(T, cap=512)
    tk = _row_tile(T, cap=256)
    return pl.pallas_call(
        partial(_flash_kernel, scale),
        out_shape=jax.ShapeDtypeStruct((B, H, T, hs), jnp.bfloat16),
        grid=(B, H, T // tq, T // tk),
        in_specs=[
            pl.BlockSpec((1, 1, 1, tq, hs), lambda b, h, qi, ki: (b, 0, h, qi, 0)),
            pl.BlockSpec((1, 1, 1, tk, hs), lambda b, h, qi, ki: (b, 1, h, ki, 0)),
            pl.BlockSpec((1, 1, 1, tk, hs), lambda b, h, qi, ki: (b, 2, h, ki, 0)),
        ],
        out_specs=pl.BlockSpec((1, 1, tq, hs), lambda b, h, qi, ki: (b, h, qi, 0)),
        scratch_shapes=[
            pltpu.VMEM((tq, hs), jnp.bfloat16),   # scaled q (written once per q tile)
            pltpu.VMEM((tq, 1), jnp.float32),     # running max
            pltpu.VMEM((tq, 1), jnp.float32),     # running denom
            pltpu.VMEM((tq, hs), jnp.float32),    # f32 accumulator
        ],
        compiler_params=pltpu.CompilerParams(
            dimension_semantics=("parallel", "parallel", "parallel", "arbitrary"),
            vmem_limit_bytes=VMEM_LIMIT),
    )(qkv_t, qkv_t, qkv_t)


def _moe_expert_kernel(xg_ref, w1_ref, b1_ref, w2_ref, b2_ref, g_ref, o_ref, acc_sc):
    # One (expert, token-tile, hidden-chunk) step over tokens gathered for this
    # expert.  Hidden dim 4C is tiled; partial products accumulate in f32 scratch.
    hi = pl.program_id(2)

    @pl.when(hi == 0)
    def _():
        acc_sc[...] = jnp.zeros_like(acc_sc)

    x = xg_ref[0]                                                        # (tn, C) bf16
    h = jnp.dot(x, w1_ref[0], preferred_element_type=jnp.float32) + b1_ref[0]
    h = jnp.maximum(h, 0.0)                                              # ReLU
    acc_sc[...] += jnp.dot(h.astype(jnp.bfloat16), w2_ref[0],
                           preferred_element_type=jnp.float32)

    @pl.when(hi == pl.num_programs(2) - 1)
    def _():
        o_ref[0] = ((acc_sc[...] + b2_ref[0]) * g_ref[0]).astype(o_ref.dtype)


def moe_experts(xg, w1, b1, w2, b2, gate):
    # xg: (E, capP, C) bf16 gathered tokens; gate: (E, capP, 1) f32.
    E, capP, C = xg.shape
    H4 = w1.shape[2]
    tn = _row_tile(capP)
    th = _col_tile(H4)
    return pl.pallas_call(
        _moe_expert_kernel,
        out_shape=jax.ShapeDtypeStruct((E, capP, C), jnp.bfloat16),
        grid=(E, capP // tn, H4 // th),
        in_specs=[
            pl.BlockSpec((1, tn, C), lambda e, n, h: (e, n, 0)),
            pl.BlockSpec((1, C, th), lambda e, n, h: (e, 0, h)),
            pl.BlockSpec((1, 1, th), lambda e, n, h: (e, 0, h)),
            pl.BlockSpec((1, th, C), lambda e, n, h: (e, h, 0)),
            pl.BlockSpec((1, 1, C), lambda e, n, h: (e, 0, 0)),
            pl.BlockSpec((1, tn, 1), lambda e, n, h: (e, n, 0)),
        ],
        out_specs=pl.BlockSpec((1, tn, C), lambda e, n, h: (e, n, 0)),
        scratch_shapes=[pltpu.VMEM((tn, C), jnp.float32)],
        compiler_params=pltpu.CompilerParams(
            dimension_semantics=("parallel", "parallel", "arbitrary"),
            vmem_limit_bytes=VMEM_LIMIT),
    )(xg, w1, b1, w2, b2, gate)


# ----------------------------- Block forward ------------------------------

def block_forward(params, x, noise_key, *, n_head, num_experts, top_k):
    B, T, C = x.shape
    H = n_head
    hs = C // H
    N = B * T
    E = num_experts
    assert N % 8 == 0, "token count must be a multiple of 8 for TPU tiling"

    x_flat = x.reshape(N, C).astype(jnp.float32)

    # ---------- x = x + out_proj(flash_attn(ln1(x))) ----------
    qkv = ln_matmul(x_flat, params["ln1_g"], params["ln1_b"], params["w_qkv"])  # (N,3C) bf16
    # Reproduce the module's exact (quirky) permute/reshape chain feeding
    # flash_attn_unpadded_qkvpacked_func, then lay q/k/v out per (b, head)
    # contiguously for the flash kernel (all relayouts are bf16).
    qkv_p = qkv.reshape(B, T, 3, H, hs).transpose(0, 2, 1, 3, 4).reshape(B, T, 3, H, hs)
    qkv_t = jnp.transpose(qkv_p, (0, 2, 3, 1, 4))        # (B, 3, H, T, hs) bf16
    scale = 1.0 / math.sqrt(hs)                          # softmax_scale=None default
    attn = flash_attention(qkv_t, scale)                 # (B, H, T, hs) bf16
    # The module's post-attention view/permute pair is exactly the row-major
    # flatten of (B, H, T, hs) into (B*T, C): a free reshape.
    attn_flat = attn.reshape(N, C)
    x_flat = matmul_residual(attn_flat, params["w_out"], x_flat)   # x + out_proj(...)

    # ---------- moe_out, ent_loss = smoe(ln2(x)); x = x + moe_out ----------
    xln2, r_logits = ln_router(x_flat, params["ln2_g"], params["ln2_b"],
                               params["w_router"], params["b_router"])
    logits = r_logits[:, :E]
    noise_logits = r_logits[:, E:]
    noise = (jax.random.normal(noise_key, logits.shape, jnp.float32)
             * jax.nn.softplus(noise_logits))
    noisy = logits + noise
    full_probs = jax.nn.softmax(noisy, axis=-1)
    top_v, top_i = jax.lax.top_k(noisy, top_k)
    sparse = jnp.full_like(noisy, -jnp.inf)
    sparse = sparse.at[jnp.arange(N)[:, None], top_i].set(top_v)
    router_out = jax.nn.softmax(sparse, axis=-1)          # (N, E), zero off the top-k

    # Per-expert token gather up to capacity (== reference limited_indices: the
    # first `cap` tokens, in flat token order, whose top-k contains e).
    cap = int(B * T * top_k / E * 1.0)                    # capacity_factor = 1.0
    capP = max(8, -(-cap // 8) * 8)                       # pad to sublane multiple
    selected = jnp.any(top_i[:, :, None] == jnp.arange(E)[None, None, :], axis=1)  # (N,E)
    order = jnp.argsort(jnp.logical_not(selected).astype(jnp.int32).T,
                        axis=1, stable=True)              # selected tokens first, ascending
    gather_idx = order[:, :capP]                          # (E, capP)
    counts = jnp.sum(selected, axis=0)
    valid = (jnp.arange(capP)[None, :] < jnp.minimum(counts, cap)[:, None])
    gate = (jnp.take_along_axis(router_out.T, gather_idx, axis=1)
            * valid.astype(jnp.float32))                  # (E, capP)

    # TODO(synk): fuse this gather + scatter-add into the expert kernel via
    # PrefetchScalarGridSpec(gather_idx) + input_output_aliases on x_flat.
    xg = jnp.take(xln2, gather_idx.reshape(-1), axis=0).reshape(E, capP, C)   # bf16
    yg = moe_experts(xg, params["w1"], params["b1"], params["w2"], params["b2"],
                     gate[..., None])                     # (E, capP, C) bf16, gated
    updates = jnp.zeros((N, C), jnp.float32).at[gather_idx.reshape(-1)].add(
        yg.reshape(E * capP, C).astype(jnp.float32))
    x_out = (x_flat + updates).reshape(B, T, C)

    # training-mode router entropy loss (dropout=0 so training/eval numerics match)
    ent = -jnp.sum(full_probs * jnp.log(full_probs + 1e-8), axis=-1)
    ent_loss = jnp.mean(ent)
    return x_out, ent_loss


# --------------------------------- main ------------------------------------

def make_params(key, n_embed, n_head, num_experts, top_k):
    C, E = n_embed, num_experts
    H4 = 4 * C
    ks = jax.random.split(key, 10)

    def init(k, shape, scale=0.02):
        return scale * jax.random.normal(k, shape, dtype=jnp.float32)

    bf16 = jnp.bfloat16
    return {
        # LayerNorms (torch defaults: weight=1, bias=0, eps=1e-5)
        "ln1_g": jnp.ones((C,), jnp.float32),
        "ln1_b": jnp.zeros((C,), jnp.float32),
        "ln2_g": jnp.ones((C,), jnp.float32),
        "ln2_b": jnp.zeros((C,), jnp.float32),
        # attention projections (stored as (in,out) = torch weight.T), bias=False
        "w_qkv": init(ks[0], (C, 3 * C)).astype(bf16),
        "w_out": init(ks[1], (C, C)).astype(bf16),
        # fused router: [topkroute_linear | noise_linear], bf16 weights / f32 bias
        "w_router": jnp.concatenate([init(ks[2], (C, E)), init(ks[4], (C, E))],
                                    axis=1).astype(bf16),
        "b_router": jnp.concatenate([init(ks[3], (E,)), init(ks[5], (E,))]),
        # experts: Linear(C,4C) -> ReLU -> Linear(4C,C) (dropout p=0)
        "w1": init(ks[6], (E, C, H4)).astype(bf16),
        "b1": init(ks[7], (E, 1, H4)),
        "w2": init(ks[8], (E, H4, C)).astype(bf16),
        "b2": init(ks[9], (E, 1, C)),
    }


if __name__ == "__main__":
    B, T = 2, 8
    n_embed, n_head = 32, 4
    num_experts, top_k = 4, 2

    root = jax.random.PRNGKey(0)
    k_params, k_x, k_noise = jax.random.split(root, 3)

    params = make_params(k_params, n_embed, n_head, num_experts, top_k)
    x = jax.random.normal(k_x, (B, T, n_embed), dtype=jnp.float32)

    block = jax.jit(partial(block_forward, n_head=n_head,
                            num_experts=num_experts, top_k=top_k))
    out, ent_loss = block(params, x, k_noise)
    out = jax.block_until_ready(out)
    ent_loss = jax.block_until_ready(ent_loss)

    assert out.shape == (B, T, n_embed)
    assert jnp.all(jnp.isfinite(out)) and jnp.isfinite(ent_loss)
    print("KERNEL_OK")
</pallas_src>

<mosaic_0001>
module attributes {stable_mosaic.version = 11 : i64} {
  func.func @_ln_matmul_kernel(%arg0: i32, %arg1: i32, %arg2: memref<16x32xf32, #tpu.memory_space<vmem>>, %arg3: memref<1x32xf32, #tpu.memory_space<vmem>>, %arg4: memref<1x32xf32, #tpu.memory_space<vmem>>, %arg5: memref<32x96xbf16, #tpu.memory_space<vmem>>, %arg6: memref<16x96xbf16, #tpu.memory_space<vmem>>, %arg7: memref<16x32xbf16, #tpu.memory_space<vmem>>) attributes {dimension_semantics = [#tpu.dimension_semantics<parallel>, #tpu.dimension_semantics<arbitrary>], iteration_bounds = array<i64: 1, 1>, scalar_prefetch = 0 : i64, scratch_operands = 1 : i64, tpu.core_type = #tpu.core_type<tc>, window_params = [{transform_indices = @transform_0, window_bounds = array<i64: 16, 32>}, {pipeline_mode = #tpu.pipeline_mode<synchronous>, transform_indices = @transform_1, window_bounds = array<i64: 1, 32>}, {pipeline_mode = #tpu.pipeline_mode<synchronous>, transform_indices = @transform_2, window_bounds = array<i64: 1, 32>}, {transform_indices = @transform_3, window_bounds = array<i64: 32, 96>}, {transform_indices = @transform_4, window_bounds = array<i64: 16, 96>}]} {
    %c0_i32 = arith.constant 0 : i32
    %0 = arith.cmpi eq, %arg1, %c0_i32 : i32
    %1 = arith.extui %0 : i1 to i32
    %c0_i32_0 = arith.constant 0 : i32
    %2 = arith.cmpi ne, %1, %c0_i32_0 : i32
    scf.if %2 {
      %c0_6 = arith.constant 0 : index
      %c0_7 = arith.constant 0 : index
      %8 = vector.load %arg2[%c0_6, %c0_7] : memref<16x32xf32, #tpu.memory_space<vmem>>, vector<16x32xf32>
      %cst_8 = arith.constant dense<0.000000e+00> : vector<16xf32>
      %9 = vector.multi_reduction <add>, %8, %cst_8 [1] : vector<16x32xf32> to vector<16xf32>
      %10 = vector.shape_cast %9 : vector<16xf32> to vector<16x1xf32>
      %cst_9 = arith.constant 3.200000e+01 : f32
      %11 = vector.broadcast %cst_9 : f32 to vector<16x1xf32>
      %12 = arith.divf %10, %11 : vector<16x1xf32>
      %13 = vector.broadcast %12 : vector<16x1xf32> to vector<16x32xf32>
      %14 = arith.subf %8, %13 : vector<16x32xf32>
      %15 = arith.mulf %14, %14 : vector<16x32xf32>
      %cst_10 = arith.constant dense<0.000000e+00> : vector<16xf32>
      %16 = vector.multi_reduction <add>, %15, %cst_10 [1] : vector<16x32xf32> to vector<16xf32>
      %17 = vector.shape_cast %16 : vector<16xf32> to vector<16x1xf32>
      %cst_11 = arith.constant 3.200000e+01 : f32
      %18 = vector.broadcast %cst_11 : f32 to vector<16x1xf32>
      %19 = arith.divf %17, %18 : vector<16x1xf32>
      %cst_12 = arith.constant 9.99999974E-6 : f32
      %20 = vector.broadcast %cst_12 : f32 to vector<16x1xf32>
      %21 = arith.addf %19, %20 : vector<16x1xf32>
      %22 = math.rsqrt %21 : vector<16x1xf32>
      %23 = vector.broadcast %22 : vector<16x1xf32> to vector<16x32xf32>
      %24 = arith.mulf %14, %23 : vector<16x32xf32>
      %c0_13 = arith.constant 0 : index
      %c0_14 = arith.constant 0 : index
      %25 = vector.load %arg3[%c0_13, %c0_14] : memref<1x32xf32, #tpu.memory_space<vmem>>, vector<1x32xf32>
      %26 = vector.broadcast %25 : vector<1x32xf32> to vector<16x32xf32>
      %27 = arith.mulf %24, %26 : vector<16x32xf32>
      %c0_15 = arith.constant 0 : index
      %c0_16 = arith.constant 0 : index
      %28 = vector.load %arg4[%c0_15, %c0_16] : memref<1x32xf32, #tpu.memory_space<vmem>>, vector<1x32xf32>
      %29 = vector.broadcast %28 : vector<1x32xf32> to vector<16x32xf32>
      %30 = arith.addf %27, %29 : vector<16x32xf32>
      %31 = arith.truncf %30 : vector<16x32xf32> to vector<16x32xbf16>
      %c0_17 = arith.constant 0 : index
      %c0_18 = arith.constant 0 : index
      %32 = vector.load %arg7[%c0_17, %c0_18] : memref<16x32xbf16, #tpu.memory_space<vmem>>, vector<16x32xbf16>
      tpu.vector_store %arg7[%c0_17, %c0_18], %31 {strides = array<i32>} : memref<16x32xbf16, #tpu.memory_space<vmem>>, vector<16x32xbf16>,
    } else {
    }
    %c0 = arith.constant 0 : index
    %c0_1 = arith.constant 0 : index
    %3 = vector.load %arg7[%c0, %c0_1] : memref<16x32xbf16, #tpu.memory_space<vmem>>, vector<16x32xbf16>
    %c0_2 = arith.constant 0 : index
    %c0_3 = arith.constant 0 : index
    %4 = vector.load %arg5[%c0_2, %c0_3] : memref<32x96xbf16, #tpu.memory_space<vmem>>, vector<32x96xbf16>
    %cst = arith.constant dense<0.000000e+00> : vector<16x96xf32>
    %5 = tpu.matmul %3, %4, %cst {dimension_numbers = #tpu.dot_dimension_numbers<[1], [0], [0], [1], [0, 0, 1, 1], [], []>} : vector<16x32xbf16>, vector<32x96xbf16>, vector<16x96xf32> -> vector<16x96xf32>
    %6 = arith.truncf %5 : vector<16x96xf32> to vector<16x96xbf16>
    %c0_4 = arith.constant 0 : index
    %c0_5 = arith.constant 0 : index
    %7 = vector.load %arg6[%c0_4, %c0_5] : memref<16x96xbf16, #tpu.memory_space<vmem>>, vector<16x96xbf16>
    tpu.vector_store %arg6[%c0_4, %c0_5], %6 {strides = array<i32>} : memref<16x96xbf16, #tpu.memory_space<vmem>>, vector<16x96xbf16>,
    return
  }
  func.func @transform_0(%arg0: i32, %arg1: i32) -> (i32, i32) {
    %c0_i32 = arith.constant 0 : i32
    %c0_i32_0 = arith.constant 0 : i32
    return %arg0, %c0_i32 : i32, i32
  }
  func.func @transform_1(%arg0: i32, %arg1: i32) -> (i32, i32) {
    %c0_i32 = arith.constant 0 : i32
    %c0_i32_0 = arith.constant 0 : i32
    %c0_i32_1 = arith.constant 0 : i32
    return %c0_i32, %c0_i32_0 : i32, i32
  }
  func.func @transform_2(%arg0: i32, %arg1: i32) -> (i32, i32) {
    %c0_i32 = arith.constant 0 : i32
    %c0_i32_0 = arith.constant 0 : i32
    %c0_i32_1 = arith.constant 0 : i32
    return %c0_i32, %c0_i32_0 : i32, i32
  }
  func.func @transform_3(%arg0: i32, %arg1: i32) -> (i32, i32) {
    %c0_i32 = arith.constant 0 : i32
    %c0_i32_0 = arith.constant 0 : i32
    return %c0_i32, %arg1 : i32, i32
  }
  func.func @transform_4(%arg0: i32, %arg1: i32) -> (i32, i32) {
    %c0_i32 = arith.constant 0 : i32
    return %arg0, %arg1 : i32, i32
  }
}

module attributes {stable_mosaic.version = 11 : i64} {
  func.func @_matmul_residual_kernel(%arg0: i32, %arg1: i32, %arg2: memref<16x32xbf16, #tpu.memory_space<vmem>>, %arg3: memref<32x32xbf16, #tpu.memory_space<vmem>>, %arg4: memref<16x32xf32, #tpu.memory_space<vmem>>, %arg5: memref<16x32xf32, #tpu.memory_space<vmem>>) attributes {dimension_semantics = [#tpu.dimension_semantics<parallel>, #tpu.dimension_semantics<parallel>], iteration_bounds = array<i64: 1, 1>, scalar_prefetch = 0 : i64, scratch_operands = 0 : i64, tpu.core_type = #tpu.core_type<tc>, window_params = [{transform_indices = @transform_0, window_bounds = array<i64: 16, 32>}, {transform_indices = @transform_1, window_bounds = array<i64: 32, 32>}, {transform_indices = @transform_2, window_bounds = array<i64: 16, 32>}, {transform_indices = @transform_3, window_bounds = array<i64: 16, 32>}]} {
    %c0 = arith.constant 0 : index
    %c0_0 = arith.constant 0 : index
    %0 = vector.load %arg4[%c0, %c0_0] : memref<16x32xf32, #tpu.memory_space<vmem>>, vector<16x32xf32>
    %c0_1 = arith.constant 0 : index
    %c0_2 = arith.constant 0 : index
    %1 = vector.load %arg2[%c0_1, %c0_2] : memref<16x32xbf16, #tpu.memory_space<vmem>>, vector<16x32xbf16>
    %c0_3 = arith.constant 0 : index
    %c0_4 = arith.constant 0 : index
    %2 = vector.load %arg3[%c0_3, %c0_4] : memref<32x32xbf16, #tpu.memory_space<vmem>>, vector<32x32xbf16>
    %cst = arith.constant dense<0.000000e+00> : vector<16x32xf32>
    %3 = tpu.matmul %1, %2, %cst {dimension_numbers = #tpu.dot_dimension_numbers<[1], [0], [0], [1], [0, 0, 1, 1], [], []>} : vector<16x32xbf16>, vector<32x32xbf16>, vector<16x32xf32> -> vector<16x32xf32>
    %4 = arith.addf %0, %3 : vector<16x32xf32>
    %c0_5 = arith.constant 0 : index
    %c0_6 = arith.constant 0 : index
    %5 = vector.load %arg5[%c0_5, %c0_6] : memref<16x32xf32, #tpu.memory_space<vmem>>, vector<16x32xf32>
    tpu.vector_store %arg5[%c0_5, %c0_6], %4 {strides = array<i32>} : memref<16x32xf32, #tpu.memory_space<vmem>>, vector<16x32xf32>,
    return
  }
  func.func @transform_0(%arg0: i32, %arg1: i32) -> (i32, i32) {
    %c0_i32 = arith.constant 0 : i32
    %c0_i32_0 = arith.constant 0 : i32
    return %arg0, %c0_i32 : i32, i32
  }
  func.func @transform_1(%arg0: i32, %arg1: i32) -> (i32, i32) {
    %c0_i32 = arith.constant 0 : i32
    %c0_i32_0 = arith.constant 0 : i32
    return %c0_i32, %arg1 : i32, i32
  }
  func.func @transform_2(%arg0: i32, %arg1: i32) -> (i32, i32) {
    %c0_i32 = arith.constant 0 : i32
    return %arg0, %arg1 : i32, i32
  }
  func.func @transform_3(%arg0: i32, %arg1: i32) -> (i32, i32) {
    %c0_i32 = arith.constant 0 : i32
    return %arg0, %arg1 : i32, i32
  }
}

module attributes {stable_mosaic.version = 11 : i64} {
  func.func @_flash_kernel(%arg0: i32, %arg1: i32, %arg2: i32, %arg3: i32, %arg4: memref<1x1x1x8x8xbf16, #tpu.memory_space<vmem>>, %arg5: memref<1x1x1x8x8xbf16, #tpu.memory_space<vmem>>, %arg6: memref<1x1x1x8x8xbf16, #tpu.memory_space<vmem>>, %arg7: memref<1x1x8x8xbf16, #tpu.memory_space<vmem>>, %arg8: memref<8x8xbf16, #tpu.memory_space<vmem>>, %arg9: memref<8x1xf32, #tpu.memory_space<vmem>>, %arg10: memref<8x1xf32, #tpu.memory_space<vmem>>, %arg11: memref<8x8xf32, #tpu.memory_space<vmem>>) attributes {dimension_semantics = [#tpu.dimension_semantics<parallel>, #tpu.dimension_semantics<parallel>, #tpu.dimension_semantics<parallel>, #tpu.dimension_semantics<arbitrary>], iteration_bounds = array<i64: 2, 4, 1, 1>, scalar_prefetch = 0 : i64, scratch_operands = 4 : i64, tpu.core_type = #tpu.core_type<tc>, window_params = [{transform_indices = @transform_0, window_bounds = array<i64: 1, 1, 1, 8, 8>}, {transform_indices = @transform_1, window_bounds = array<i64: 1, 1, 1, 8, 8>}, {transform_indices = @transform_2, window_bounds = array<i64: 1, 1, 1, 8, 8>}, {transform_indices = @transform_3, window_bounds = array<i64: 1, 1, 8, 8>}]} {
    %c0_i32 = arith.constant 0 : i32
    %0 = arith.cmpi eq, %arg3, %c0_i32 : i32
    %1 = arith.extui %0 : i1 to i32
    %c0_i32_0 = arith.constant 0 : i32
    %2 = arith.cmpi ne, %1, %c0_i32_0 : i32
    scf.if %2 {
      %c0_29 = arith.constant 0 : index
      %c0_30 = arith.constant 0 : index
      %c0_31 = arith.constant 0 : index
      %c0_32 = arith.constant 0 : index
      %c0_33 = arith.constant 0 : index
      %35 = vector.load %arg4[%c0_29, %c0_30, %c0_31, %c0_32, %c0_33] : memref<1x1x1x8x8xbf16, #tpu.memory_space<vmem>>, vector<1x1x1x8x8xbf16>
      %36 = vector.shape_cast %35 : vector<1x1x1x8x8xbf16> to vector<8x8xbf16>
      %cst_34 = arith.constant 3.535160e-01 : bf16
      %37 = vector.broadcast %cst_34 : bf16 to vector<8x8xbf16>
      %38 = arith.mulf %36, %37 : vector<8x8xbf16>
      %c0_35 = arith.constant 0 : index
      %c0_36 = arith.constant 0 : index
      %39 = vector.load %arg8[%c0_35, %c0_36] : memref<8x8xbf16, #tpu.memory_space<vmem>>, vector<8x8xbf16>
      tpu.vector_store %arg8[%c0_35, %c0_36], %38 {strides = array<i32>} : memref<8x8xbf16, #tpu.memory_space<vmem>>, vector<8x8xbf16>,
      %cst_37 = arith.constant 0xFF800000 : f32
      %40 = vector.broadcast %cst_37 : f32 to vector<8x1xf32>
      %c0_38 = arith.constant 0 : index
      %c0_39 = arith.constant 0 : index
      %41 = vector.load %arg9[%c0_38, %c0_39] : memref<8x1xf32, #tpu.memory_space<vmem>>, vector<8x1xf32>
      tpu.vector_store %arg9[%c0_38, %c0_39], %40 {strides = array<i32>} : memref<8x1xf32, #tpu.memory_space<vmem>>, vector<8x1xf32>,
      %cst_40 = arith.constant 0.000000e+00 : f32
      %42 = vector.broadcast %cst_40 : f32 to vector<8x1xf32>
      %c0_41 = arith.constant 0 : index
      %c0_42 = arith.constant 0 : index
      %43 = vector.load %arg10[%c0_41, %c0_42] : memref<8x1xf32, #tpu.memory_space<vmem>>, vector<8x1xf32>
      tpu.vector_store %arg10[%c0_41, %c0_42], %42 {strides = array<i32>} : memref<8x1xf32, #tpu.memory_space<vmem>>, vector<8x1xf32>,
      %cst_43 = arith.constant 0.000000e+00 : f32
      %44 = vector.broadcast %cst_43 : f32 to vector<8x8xf32>
      %c0_44 = arith.constant 0 : index
      %c0_45 = arith.constant 0 : index
      %45 = vector.load %arg11[%c0_44, %c0_45] : memref<8x8xf32, #tpu.memory_space<vmem>>, vector<8x8xf32>
      tpu.vector_store %arg11[%c0_44, %c0_45], %44 {strides = array<i32>} : memref<8x8xf32, #tpu.memory_space<vmem>>, vector<8x8xf32>,
    } else {
    }
    %c0 = arith.constant 0 : index
    %c0_1 = arith.constant 0 : index
    %c0_2 = arith.constant 0 : index
    %c0_3 = arith.constant 0 : index
    %c0_4 = arith.constant 0 : index
    %3 = vector.load %arg5[%c0, %c0_1, %c0_2, %c0_3, %c0_4] : memref<1x1x1x8x8xbf16, #tpu.memory_space<vmem>>, vector<1x1x1x8x8xbf16>
    %4 = vector.shape_cast %3 : vector<1x1x1x8x8xbf16> to vector<8x8xbf16>
    %c0_5 = arith.constant 0 : index
    %c0_6 = arith.constant 0 : index
    %c0_7 = arith.constant 0 : index
    %c0_8 = arith.constant 0 : index
    %c0_9 = arith.constant 0 : index
    %5 = vector.load %arg6[%c0_5, %c0_6, %c0_7, %c0_8, %c0_9] : memref<1x1x1x8x8xbf16, #tpu.memory_space<vmem>>, vector<1x1x1x8x8xbf16>
    %6 = vector.shape_cast %5 : vector<1x1x1x8x8xbf16> to vector<8x8xbf16>
    %c0_10 = arith.constant 0 : index
    %c0_11 = arith.constant 0 : index
    %7 = vector.load %arg8[%c0_10, %c0_11] : memref<8x8xbf16, #tpu.memory_space<vmem>>, vector<8x8xbf16>
    %cst = arith.constant dense<0.000000e+00> : vector<8x8xf32>
    %8 = tpu.matmul %7, %4, %cst {dimension_numbers = #tpu.dot_dimension_numbers<[1], [1], [0], [0], [0, 0, 1, 0], [], []>} : vector<8x8xbf16>, vector<8x8xbf16>, vector<8x8xf32> -> vector<8x8xf32>
    %c0_12 = arith.constant 0 : index
    %c0_13 = arith.constant 0 : index
    %9 = vector.load %arg9[%c0_12, %c0_13] : memref<8x1xf32, #tpu.memory_space<vmem>>, vector<8x1xf32>
    %cst_14 = arith.constant dense<0xFF800000> : vector<8xf32>
    %10 = vector.multi_reduction <maximumf>, %8, %cst_14 [1] : vector<8x8xf32> to vector<8xf32>
    %11 = vector.shape_cast %10 : vector<8xf32> to vector<8x1xf32>
    %12 = arith.maximumf %9, %11 : vector<8x1xf32>
    %13 = arith.subf %9, %12 : vector<8x1xf32>
    %14 = math.exp %13 : vector<8x1xf32>
    %15 = vector.broadcast %12 : vector<8x1xf32> to vector<8x8xf32>
    %16 = arith.subf %8, %15 : vector<8x8xf32>
    %17 = math.exp %16 : vector<8x8xf32>
    %c0_15 = arith.constant 0 : index
    %c0_16 = arith.constant 0 : index
    %18 = vector.load %arg10[%c0_15, %c0_16] : memref<8x1xf32, #tpu.memory_space<vmem>>, vector<8x1xf32>
    %19 = arith.mulf %14, %18 : vector<8x1xf32>
    %cst_17 = arith.constant dense<0.000000e+00> : vector<8xf32>
    %20 = vector.multi_reduction <add>, %17, %cst_17 [1] : vector<8x8xf32> to vector<8xf32>
    %21 = vector.shape_cast %20 : vector<8xf32> to vector<8x1xf32>
    %22 = arith.addf %19, %21 : vector<8x1xf32>
    %c0_18 = arith.constant 0 : index
    %c0_19 = arith.constant 0 : index
    %23 = vector.load %arg10[%c0_18, %c0_19] : memref<8x1xf32, #tpu.memory_space<vmem>>, vector<8x1xf32>
    tpu.vector_store %arg10[%c0_18, %c0_19], %22 {strides = array<i32>} : memref<8x1xf32, #tpu.memory_space<vmem>>, vector<8x1xf32>,
    %c0_20 = arith.constant 0 : index
    %c0_21 = arith.constant 0 : index
    %24 = vector.load %arg11[%c0_20, %c0_21] : memref<8x8xf32, #tpu.memory_space<vmem>>, vector<8x8xf32>
    %25 = vector.broadcast %14 : vector<8x1xf32> to vector<8x8xf32>
    %26 = arith.mulf %25, %24 : vector<8x8xf32>
    %27 = arith.truncf %17 : vector<8x8xf32> to vector<8x8xbf16>
    %cst_22 = arith.constant dense<0.000000e+00> : vector<8x8xf32>
    %28 = tpu.matmul %27, %6, %cst_22 {dimension_numbers = #tpu.dot_dimension_numbers<[1], [0], [0], [1], [0, 0, 1, 1], [], []>} : vector<8x8xbf16>, vector<8x8xbf16>, vector<8x8xf32> -> vector<8x8xf32>
    %29 = arith.addf %26, %28 : vector<8x8xf32>
    %c0_23 = arith.constant 0 : index
    %c0_24 = arith.constant 0 : index
    %30 = vector.load %arg11[%c0_23, %c0_24] : memref<8x8xf32, #tpu.memory_space<vmem>>, vector<8x8xf32>
    tpu.vector_store %arg11[%c0_23, %c0_24], %29 {strides = array<i32>} : memref<8x8xf32, #tpu.memory_space<vmem>>, vector<8x8xf32>,
    %c0_25 = arith.constant 0 : index
    %c0_26 = arith.constant 0 : index
    %31 = vector.load %arg9[%c0_25, %c0_26] : memref<8x1xf32, #tpu.memory_space<vmem>>, vector<8x1xf32>
    tpu.vector_store %arg9[%c0_25, %c0_26], %12 {strides = array<i32>} : memref<8x1xf32, #tpu.memory_space<vmem>>, vector<8x1xf32>,
    %c0_i32_27 = arith.constant 0 : i32
    %32 = arith.cmpi eq, %arg3, %c0_i32_27 : i32
    %33 = arith.extui %32 : i1 to i32
    %c0_i32_28 = arith.constant 0 : i32
    %34 = arith.cmpi ne, %33, %c0_i32_28 : i32
    scf.if %34 {
      %c0_29 = arith.constant 0 : index
      %c0_30 = arith.constant 0 : index
      %35 = vector.load %arg10[%c0_29, %c0_30] : memref<8x1xf32, #tpu.memory_space<vmem>>, vector<8x1xf32>
      %36 = tpu.reciprocal %35 {approx = true} : vector<8x1xf32> -> vector<8x1xf32>
      %c0_31 = arith.constant 0 : index
      %c0_32 = arith.constant 0 : index
      %37 = vector.load %arg11[%c0_31, %c0_32] : memref<8x8xf32, #tpu.memory_space<vmem>>, vector<8x8xf32>
      %38 = vector.broadcast %36 : vector<8x1xf32> to vector<8x8xf32>
      %39 = arith.mulf %37, %38 : vector<8x8xf32>
      %40 = arith.truncf %39 : vector<8x8xf32> to vector<8x8xbf16>
      %c0_33 = arith.constant 0 : index
      %c0_34 = arith.constant 0 : index
      %c0_35 = arith.constant 0 : index
      %c0_36 = arith.constant 0 : index
      %41 = vector.load %arg7[%c0_33, %c0_34, %c0_35, %c0_36] : memref<1x1x8x8xbf16, #tpu.memory_space<vmem>>, vector<1x1x8x8xbf16>
      %42 = vector.shape_cast %41 : vector<1x1x8x8xbf16> to vector<8x8xbf16>
      %43 = vector.shape_cast %40 : vector<8x8xbf16> to vector<1x1x8x8xbf16>
      tpu.vector_store %arg7[%c0_33, %c0_34, %c0_35, %c0_36], %43 {strides = array<i32>} : memref<1x1x8x8xbf16, #tpu.memory_space<vmem>>, vector<1x1x8x8xbf16>,
    } else {
    }
    return
  }
  func.func @transform_0(%arg0: i32, %arg1: i32, %arg2: i32, %arg3: i32) -> (i32, i32, i32, i32, i32) {
    %c0_i32 = arith.constant 0 : i32
    %c0_i32_0 = arith.constant 0 : i32
    %c0_i32_1 = arith.constant 0 : i32
    return %arg0, %c0_i32, %arg1, %arg2, %c0_i32_0 : i32, i32, i32, i32, i32
  }
  func.func @transform_1(%arg0: i32, %arg1: i32, %arg2: i32, %arg3: i32) -> (i32, i32, i32, i32, i32) {
    %c1_i32 = arith.constant 1 : i32
    %c0_i32 = arith.constant 0 : i32
    %c0_i32_0 = arith.constant 0 : i32
    return %arg0, %c1_i32, %arg1, %arg3, %c0_i32 : i32, i32, i32, i32, i32
  }
  func.func @transform_2(%arg0: i32, %arg1: i32, %arg2: i32, %arg3: i32) -> (i32, i32, i32, i32, i32) {
    %c2_i32 = arith.constant 2 : i32
    %c0_i32 = arith.constant 0 : i32
    %c0_i32_0 = arith.constant 0 : i32
    return %arg0, %c2_i32, %arg1, %arg3, %c0_i32 : i32, i32, i32, i32, i32
  }
  func.func @transform_3(%arg0: i32, %arg1: i32, %arg2: i32, %arg3: i32) -> (i32, i32, i32, i32) {
    %c0_i32 = arith.constant 0 : i32
    %c0_i32_0 = arith.constant 0 : i32
    return %arg0, %arg1, %arg2, %c0_i32 : i32, i32, i32, i32
  }
}

module attributes {stable_mosaic.version = 11 : i64} {
  func.func @_ln_router_kernel(%arg0: i32, %arg1: memref<16x32xf32, #tpu.memory_space<vmem>>, %arg2: memref<1x32xf32, #tpu.memory_space<vmem>>, %arg3: memref<1x32xf32, #tpu.memory_space<vmem>>, %arg4: memref<32x8xbf16, #tpu.memory_space<vmem>>, %arg5: memref<1x8xf32, #tpu.memory_space<vmem>>, %arg6: memref<16x32xbf16, #tpu.memory_space<vmem>>, %arg7: memref<16x8xf32, #tpu.memory_space<vmem>>) attributes {dimension_semantics = [#tpu.dimension_semantics<parallel>], iteration_bounds = array<i64: 1>, scalar_prefetch = 0 : i64, scratch_operands = 0 : i64, tpu.core_type = #tpu.core_type<tc>, window_params = [{transform_indices = @transform_0, window_bounds = array<i64: 16, 32>}, {pipeline_mode = #tpu.pipeline_mode<synchronous>, transform_indices = @transform_1, window_bounds = array<i64: 1, 32>}, {pipeline_mode = #tpu.pipeline_mode<synchronous>, transform_indices = @transform_2, window_bounds = array<i64: 1, 32>}, {pipeline_mode = #tpu.pipeline_mode<synchronous>, transform_indices = @transform_3, window_bounds = array<i64: 32, 8>}, {pipeline_mode = #tpu.pipeline_mode<synchronous>, transform_indices = @transform_4, window_bounds = array<i64: 1, 8>}, {transform_indices = @transform_5, window_bounds = array<i64: 16, 32>}, {transform_indices = @transform_6, window_bounds = array<i64: 16, 8>}]} {
    %c0 = arith.constant 0 : index
    %c0_0 = arith.constant 0 : index
    %0 = vector.load %arg1[%c0, %c0_0] : memref<16x32xf32, #tpu.memory_space<vmem>>, vector<16x32xf32>
    %cst = arith.constant dense<0.000000e+00> : vector<16xf32>
    %1 = vector.multi_reduction <add>, %0, %cst [1] : vector<16x32xf32> to vector<16xf32>
    %2 = vector.shape_cast %1 : vector<16xf32> to vector<16x1xf32>
    %cst_1 = arith.constant 3.200000e+01 : f32
    %3 = vector.broadcast %cst_1 : f32 to vector<16x1xf32>
    %4 = arith.divf %2, %3 : vector<16x1xf32>
    %5 = vector.broadcast %4 : vector<16x1xf32> to vector<16x32xf32>
    %6 = arith.subf %0, %5 : vector<16x32xf32>
    %7 = arith.mulf %6, %6 : vector<16x32xf32>
    %cst_2 = arith.constant dense<0.000000e+00> : vector<16xf32>
    %8 = vector.multi_reduction <add>, %7, %cst_2 [1] : vector<16x32xf32> to vector<16xf32>
    %9 = vector.shape_cast %8 : vector<16xf32> to vector<16x1xf32>
    %cst_3 = arith.constant 3.200000e+01 : f32
    %10 = vector.broadcast %cst_3 : f32 to vector<16x1xf32>
    %11 = arith.divf %9, %10 : vector<16x1xf32>
    %cst_4 = arith.constant 9.99999974E-6 : f32
    %12 = vector.broadcast %cst_4 : f32 to vector<16x1xf32>
    %13 = arith.addf %11, %12 : vector<16x1xf32>
    %14 = math.rsqrt %13 : vector<16x1xf32>
    %15 = vector.broadcast %14 : vector<16x1xf32> to vector<16x32xf32>
    %16 = arith.mulf %6, %15 : vector<16x32xf32>
    %c0_5 = arith.constant 0 : index
    %c0_6 = arith.constant 0 : index
    %17 = vector.load %arg2[%c0_5, %c0_6] : memref<1x32xf32, #tpu.memory_space<vmem>>, vector<1x32xf32>
    %18 = vector.broadcast %17 : vector<1x32xf32> to vector<16x32xf32>
    %19 = arith.mulf %16, %18 : vector<16x32xf32>
    %c0_7 = arith.constant 0 : index
    %c0_8 = arith.constant 0 : index
    %20 = vector.load %arg3[%c0_7, %c0_8] : memref<1x32xf32, #tpu.memory_space<vmem>>, vector<1x32xf32>
    %21 = vector.broadcast %20 : vector<1x32xf32> to vector<16x32xf32>
    %22 = arith.addf %19, %21 : vector<16x32xf32>
    %23 = arith.truncf %22 : vector<16x32xf32> to vector<16x32xbf16>
    %c0_9 = arith.constant 0 : index
    %c0_10 = arith.constant 0 : index
    %24 = vector.load %arg6[%c0_9, %c0_10] : memref<16x32xbf16, #tpu.memory_space<vmem>>, vector<16x32xbf16>
    tpu.vector_store %arg6[%c0_9, %c0_10], %23 {strides = array<i32>} : memref<16x32xbf16, #tpu.memory_space<vmem>>, vector<16x32xbf16>,
    %c0_11 = arith.constant 0 : index
    %c0_12 = arith.constant 0 : index
    %25 = vector.load %arg4[%c0_11, %c0_12] : memref<32x8xbf16, #tpu.memory_space<vmem>>, vector<32x8xbf16>
    %cst_13 = arith.constant dense<0.000000e+00> : vector<16x8xf32>
    %26 = tpu.matmul %23, %25, %cst_13 {dimension_numbers = #tpu.dot_dimension_numbers<[1], [0], [0], [1], [0, 0, 1, 1], [], []>} : vector<16x32xbf16>, vector<32x8xbf16>, vector<16x8xf32> -> vector<16x8xf32>
    %c0_14 = arith.constant 0 : index
    %c0_15 = arith.constant 0 : index
    %27 = vector.load %arg5[%c0_14, %c0_15] : memref<1x8xf32, #tpu.memory_space<vmem>>, vector<1x8xf32>
    %28 = vector.broadcast %27 : vector<1x8xf32> to vector<16x8xf32>
    %29 = arith.addf %26, %28 : vector<16x8xf32>
    %c0_16 = arith.constant 0 : index
    %c0_17 = arith.constant 0 : index
    %30 = vector.load %arg7[%c0_16, %c0_17] : memref<16x8xf32, #tpu.memory_space<vmem>>, vector<16x8xf32>
    tpu.vector_store %arg7[%c0_16, %c0_17], %29 {strides = array<i32>} : memref<16x8xf32, #tpu.memory_space<vmem>>, vector<16x8xf32>,
    return
  }
  func.func @transform_0(%arg0: i32) -> (i32, i32) {
    %c0_i32 = arith.constant 0 : i32
    %c0_i32_0 = arith.constant 0 : i32
    return %arg0, %c0_i32 : i32, i32
  }
  func.func @transform_1(%arg0: i32) -> (i32, i32) {
    %c0_i32 = arith.constant 0 : i32
    %c0_i32_0 = arith.constant 0 : i32
    %c0_i32_1 = arith.constant 0 : i32
    return %c0_i32, %c0_i32_0 : i32, i32
  }
  func.func @transform_2(%arg0: i32) -> (i32, i32) {
    %c0_i32 = arith.constant 0 : i32
    %c0_i32_0 = arith.constant 0 : i32
    %c0_i32_1 = arith.constant 0 : i32
    return %c0_i32, %c0_i32_0 : i32, i32
  }
  func.func @transform_3(%arg0: i32) -> (i32, i32) {
    %c0_i32 = arith.constant 0 : i32
    %c0_i32_0 = arith.constant 0 : i32
    %c0_i32_1 = arith.constant 0 : i32
    return %c0_i32, %c0_i32_0 : i32, i32
  }
  func.func @transform_4(%arg0: i32) -> (i32, i32) {
    %c0_i32 = arith.constant 0 : i32
    %c0_i32_0 = arith.constant 0 : i32
    %c0_i32_1 = arith.constant 0 : i32
    return %c0_i32, %c0_i32_0 : i32, i32
  }
  func.func @transform_5(%arg0: i32) -> (i32, i32) {
    %c0_i32 = arith.constant 0 : i32
    %c0_i32_0 = arith.constant 0 : i32
    return %arg0, %c0_i32 : i32, i32
  }
  func.func @transform_6(%arg0: i32) -> (i32, i32) {
    %c0_i32 = arith.constant 0 : i32
    %c0_i32_0 = arith.constant 0 : i32
    return %arg0, %c0_i32 : i32, i32
  }
}

module attributes {stable_mosaic.version = 11 : i64} {
  func.func @_moe_expert_kernel(%arg0: i32, %arg1: i32, %arg2: i32, %arg3: memref<1x8x32xbf16, #tpu.memory_space<vmem>>, %arg4: memref<1x32x128xbf16, #tpu.memory_space<vmem>>, %arg5: memref<1x1x128xf32, #tpu.memory_space<vmem>>, %arg6: memref<1x128x32xbf16, #tpu.memory_space<vmem>>, %arg7: memref<1x1x32xf32, #tpu.memory_space<vmem>>, %arg8: memref<1x8x1xf32, #tpu.memory_space<vmem>>, %arg9: memref<1x8x32xbf16, #tpu.memory_space<vmem>>, %arg10: memref<8x32xf32, #tpu.memory_space<vmem>>) attributes {dimension_semantics = [#tpu.dimension_semantics<parallel>, #tpu.dimension_semantics<parallel>, #tpu.dimension_semantics<arbitrary>], iteration_bounds = array<i64: 4, 1, 1>, scalar_prefetch = 0 : i64, scratch_operands = 1 : i64, tpu.core_type = #tpu.core_type<tc>, window_params = [{transform_indices = @transform_0, window_bounds = array<i64: 1, 8, 32>}, {transform_indices = @transform_1, window_bounds = array<i64: 1, 32, 128>}, {transform_indices = @transform_2, window_bounds = array<i64: 1, 1, 128>}, {transform_indices = @transform_3, window_bounds = array<i64: 1, 128, 32>}, {transform_indices = @transform_4, window_bounds = array<i64: 1, 1, 32>}, {transform_indices = @transform_5, window_bounds = array<i64: 1, 8, 1>}, {transform_indices = @transform_6, window_bounds = array<i64: 1, 8, 32>}]} {
    %c0_i32 = arith.constant 0 : i32
    %0 = arith.cmpi eq, %arg2, %c0_i32 : i32
    %1 = arith.extui %0 : i1 to i32
    %c0_i32_0 = arith.constant 0 : i32
    %2 = arith.cmpi ne, %1, %c0_i32_0 : i32
    scf.if %2 {
      %cst_20 = arith.constant 0.000000e+00 : f32
      %24 = vector.broadcast %cst_20 : f32 to vector<8x32xf32>
      %c0_21 = arith.constant 0 : index
      %c0_22 = arith.constant 0 : index
      %25 = vector.load %arg10[%c0_21, %c0_22] : memref<8x32xf32, #tpu.memory_space<vmem>>, vector<8x32xf32>
      tpu.vector_store %arg10[%c0_21, %c0_22], %24 {strides = array<i32>} : memref<8x32xf32, #tpu.memory_space<vmem>>, vector<8x32xf32>,
    } else {
    }
    %c0 = arith.constant 0 : index
    %c0_1 = arith.constant 0 : index
    %c0_2 = arith.constant 0 : index
    %3 = vector.load %arg3[%c0, %c0_1, %c0_2] : memref<1x8x32xbf16, #tpu.memory_space<vmem>>, vector<1x8x32xbf16>
    %4 = vector.shape_cast %3 : vector<1x8x32xbf16> to vector<8x32xbf16>
    %c0_3 = arith.constant 0 : index
    %c0_4 = arith.constant 0 : index
    %c0_5 = arith.constant 0 : index
    %5 = vector.load %arg4[%c0_3, %c0_4, %c0_5] : memref<1x32x128xbf16, #tpu.memory_space<vmem>>, vector<1x32x128xbf16>
    %6 = vector.shape_cast %5 : vector<1x32x128xbf16> to vector<32x128xbf16>
    %cst = arith.constant dense<0.000000e+00> : vector<8x128xf32>
    %7 = tpu.matmul %4, %6, %cst {dimension_numbers = #tpu.dot_dimension_numbers<[1], [0], [0], [1], [0, 0, 1, 1], [], []>} : vector<8x32xbf16>, vector<32x128xbf16>, vector<8x128xf32> -> vector<8x128xf32>
    %c0_6 = arith.constant 0 : index
    %c0_7 = arith.constant 0 : index
    %c0_8 = arith.constant 0 : index
    %8 = vector.load %arg5[%c0_6, %c0_7, %c0_8] : memref<1x1x128xf32, #tpu.memory_space<vmem>>, vector<1x1x128xf32>
    %9 = vector.shape_cast %8 : vector<1x1x128xf32> to vector<1x128xf32>
    %10 = vector.broadcast %9 : vector<1x128xf32> to vector<8x128xf32>
    %11 = arith.addf %7, %10 : vector<8x128xf32>
    %cst_9 = arith.constant 0.000000e+00 : f32
    %12 = vector.broadcast %cst_9 : f32 to vector<8x128xf32>
    %13 = arith.maximumf %11, %12 : vector<8x128xf32>
    %c0_10 = arith.constant 0 : index
    %c0_11 = arith.constant 0 : index
    %14 = vector.load %arg10[%c0_10, %c0_11] : memref<8x32xf32, #tpu.memory_space<vmem>>, vector<8x32xf32>
    %15 = arith.truncf %13 : vector<8x128xf32> to vector<8x128xbf16>
    %c0_12 = arith.constant 0 : index
    %c0_13 = arith.constant 0 : index
    %c0_14 = arith.constant 0 : index
    %16 = vector.load %arg6[%c0_12, %c0_13, %c0_14] : memref<1x128x32xbf16, #tpu.memory_space<vmem>>, vector<1x128x32xbf16>
    %17 = vector.shape_cast %16 : vector<1x128x32xbf16> to vector<128x32xbf16>
    %cst_15 = arith.constant dense<0.000000e+00> : vector<8x32xf32>
    %18 = tpu.matmul %15, %17, %cst_15 {dimension_numbers = #tpu.dot_dimension_numbers<[1], [0], [0], [1], [0, 0, 1, 1], [], []>} : vector<8x128xbf16>, vector<128x32xbf16>, vector<8x32xf32> -> vector<8x32xf32>
    %19 = arith.addf %14, %18 : vector<8x32xf32>
    %c0_16 = arith.constant 0 : index
    %c0_17 = arith.constant 0 : index
    %20 = vector.load %arg10[%c0_16, %c0_17] : memref<8x32xf32, #tpu.memory_space<vmem>>, vector<8x32xf32>
    tpu.vector_store %arg10[%c0_16, %c0_17], %19 {strides = array<i32>} : memref<8x32xf32, #tpu.memory_space<vmem>>, vector<8x32xf32>,
    %c0_i32_18 = arith.constant 0 : i32
    %21 = arith.cmpi eq, %arg2, %c0_i32_18 : i32
    %22 = arith.extui %21 : i1 to i32
    %c0_i32_19 = arith.constant 0 : i32
    %23 = arith.cmpi ne, %22, %c0_i32_19 : i32
    scf.if %23 {
      %c0_20 = arith.constant 0 : index
      %c0_21 = arith.constant 0 : index
      %24 = vector.load %arg10[%c0_20, %c0_21] : memref<8x32xf32, #tpu.memory_space<vmem>>, vector<8x32xf32>
      %c0_22 = arith.constant 0 : index
      %c0_23 = arith.constant 0 : index
      %c0_24 = arith.constant 0 : index
      %25 = vector.load %arg7[%c0_22, %c0_23, %c0_24] : memref<1x1x32xf32, #tpu.memory_space<vmem>>, vector<1x1x32xf32>
      %26 = vector.shape_cast %25 : vector<1x1x32xf32> to vector<1x32xf32>
      %27 = vector.broadcast %26 : vector<1x32xf32> to vector<8x32xf32>
      %28 = arith.addf %24, %27 : vector<8x32xf32>
      %c0_25 = arith.constant 0 : index
      %c0_26 = arith.constant 0 : index
      %c0_27 = arith.constant 0 : index
      %29 = vector.load %arg8[%c0_25, %c0_26, %c0_27] : memref<1x8x1xf32, #tpu.memory_space<vmem>>, vector<1x8x1xf32>
      %30 = vector.shape_cast %29 : vector<1x8x1xf32> to vector<8x1xf32>
      %31 = vector.broadcast %30 : vector<8x1xf32> to vector<8x32xf32>
      %32 = arith.mulf %28, %31 : vector<8x32xf32>
      %33 = arith.truncf %32 : vector<8x32xf32> to vector<8x32xbf16>
      %c0_28 = arith.constant 0 : index
      %c0_29 = arith.constant 0 : index
      %c0_30 = arith.constant 0 : index
      %34 = vector.load %arg9[%c0_28, %c0_29, %c0_30] : memref<1x8x32xbf16, #tpu.memory_space<vmem>>, vector<1x8x32xbf16>
      %35 = vector.shape_cast %34 : vector<1x8x32xbf16> to vector<8x32xbf16>
      %36 = vector.shape_cast %33 : vector<8x32xbf16> to vector<1x8x32xbf16>
      tpu.vector_store %arg9[%c0_28, %c0_29, %c0_30], %36 {strides = array<i32>} : memref<1x8x32xbf16, #tpu.memory_space<vmem>>, vector<1x8x32xbf16>,
    } else {
    }
    return
  }
  func.func @transform_0(%arg0: i32, %arg1: i32, %arg2: i32) -> (i32, i32, i32) {
    %c0_i32 = arith.constant 0 : i32
    %c0_i32_0 = arith.constant 0 : i32
    return %arg0, %arg1, %c0_i32 : i32, i32, i32
  }
  func.func @transform_1(%arg0: i32, %arg1: i32, %arg2: i32) -> (i32, i32, i32) {
    %c0_i32 = arith.constant 0 : i32
    %c0_i32_0 = arith.constant 0 : i32
    return %arg0, %c0_i32, %arg2 : i32, i32, i32
  }
  func.func @transform_2(%arg0: i32, %arg1: i32, %arg2: i32) -> (i32, i32, i32) {
    %c0_i32 = arith.constant 0 : i32
    %c0_i32_0 = arith.constant 0 : i32
    return %arg0, %c0_i32, %arg2 : i32, i32, i32
  }
  func.func @transform_3(%arg0: i32, %arg1: i32, %arg2: i32) -> (i32, i32, i32) {
    %c0_i32 = arith.constant 0 : i32
    %c0_i32_0 = arith.constant 0 : i32
    return %arg0, %arg2, %c0_i32 : i32, i32, i32
  }
  func.func @transform_4(%arg0: i32, %arg1: i32, %arg2: i32) -> (i32, i32, i32) {
    %c0_i32 = arith.constant 0 : i32
    %c0_i32_0 = arith.constant 0 : i32
    %c0_i32_1 = arith.constant 0 : i32
    return %arg0, %c0_i32, %c0_i32_0 : i32, i32, i32
  }
  func.func @transform_5(%arg0: i32, %arg1: i32, %arg2: i32) -> (i32, i32, i32) {
    %c0_i32 = arith.constant 0 : i32
    %c0_i32_0 = arith.constant 0 : i32
    return %arg0, %arg1, %c0_i32 : i32, i32, i32
  }
  func.func @transform_6(%arg0: i32, %arg1: i32, %arg2: i32) -> (i32, i32, i32) {
    %c0_i32 = arith.constant 0 : i32
    %c0_i32_0 = arith.constant 0 : i32
    return %arg0, %arg1, %c0_i32 : i32, i32, i32
  }
}

</mosaic_0001>

<bundles_post_ra>
// kernel: block_forward.5
= control target key start
LH: loop header
LB: loop body
LE: loop exit
PB: predicated region body
PF: predicated region fallthrough
CT: control target
= control target key end

     0   :  { %9 = vsyncpa [#allocation4], 0  ;;  %s493_s0 = inlined_call_operand.hbm [shape: f32[16,32], index: 0, kind: input, shape index: {}]   ;;  %s494_s1 = inlined_call_operand.hbm [shape: f32[1,32], index: 1, kind: input, shape index: {}]   ;;  %s495_s2 = inlined_call_operand.hbm [shape: f32[1,32], index: 2, kind: input, shape index: {}]   ;;  %s496_s3 = inlined_call_operand.hbm [shape: bf16[32,96], index: 3, kind: input, shape index: {}]   ;;  %s497_s4 = inlined_call_operand.hbm [shape: bf16[16,96], index: 4, kind: output, shape index: {}]  }
   0x1   :  { %10 = vsyncpa [#allocation7], 0 }
   0x2   :  { %11 = vsyncpa [#allocation10], 0 }
   0x3   :  { %12 = vsyncpa [#allocation5], 0  ;;  %s371_s15 = smov [#allocation6]   ;;  %s372_s17 = smov [#allocation3]  }
   0x4   :  { %s31_s16 = sshll.u32 %s371_s15, 4  ;;  %s18_s18 = sshll.u32 %s372_s17, 4  ;;  %s32_s16 = int_to_ptr.vmem [resolvable:$true] %s31_s16  ;;  %s407_s18 = int_to_ptr.vmem [resolvable:$true] %s18_s18 }
   0x5   :  { %s253_s21 = scalar_lea.hbm %s494_s1, 16 }
   0x6   :  { %p254_p0 = scmp.ne.s32.totalorder %s494_s1, %s253_s21  ;;  %p257_p1 = scmp.lt.u32.totalorder %s253_s21, %s494_s1 }
   0x8   :  { %p259_p2 = pnand %p257_p1, %p254_p0 }
   0xa   :  { %262 = shalt.err (!%p259_p2)
}
   0xb   :  { %s263_s26 = scalar_lea.vmem %s32_s16, 16  ;;  %s267_s27 = scalar_lea.vmem %s32_s16, 32 }
   0xc   :  { %p264_p3 = scmp.ne.s32.totalorder %s32_s16, %s263_s26  ;;  %p268_p4 = scmp.lt.s32.totalorder %s32_s16, %s32_s16 }
   0xd   :  { %p269_p5 = scmp.lt.s32.totalorder %s267_s27, %s263_s26 }
   0xf   :  { %p270_p6 = por %p269_p5, %p268_p4 }
  0x11   :  { %p271_p7 = pnand %p270_p6, %p264_p3 }
  0x13   :  { %274 = shalt.err (!%p271_p7)
}
  0x14   :  { %34 = dma.hbm_to_vmem [thread:$0]  %s494_s1, 16, %s32_s16, [#allocation7]  }
  0x15   :  { %s275_s6 = scalar_lea.hbm %s493_s0, 256 }
  0x16   :  { %p276_p8 = scmp.ne.s32.totalorder %s493_s0, %s275_s6  ;;  %p279_p9 = scmp.lt.u32.totalorder %s275_s6, %s493_s0 }
  0x18   :  { %p281_p10 = pnand %p279_p9, %p276_p8 }
  0x1a   :  { %284 = shalt.err (!%p281_p10)
}
  0x1b   :  { %s285_s11 = scalar_lea.vmem %s407_s18, 256  ;;  %p290_p12 = scmp.lt.s32.totalorder %s407_s18, %s407_s18 }
  0x1c   :  { %p286_p11 = scmp.ne.s32.totalorder %s407_s18, %s285_s11  ;;  %p291_p13 = scmp.lt.s32.totalorder %s285_s11, %s285_s11 }
  0x1e   :  { %p292_p0 = por %p291_p13, %p290_p12 }
  0x20   :  { %p293_p1 = pnand %p292_p0, %p286_p11 }
  0x22   :  { %296 = shalt.err (!%p293_p1)
}
  0x23   :  { %s373_s1 = smov 128   ;;  %s374_s12 = smov 8  }
  0x24   :  { %24 = dma.hbm_to_vmem [thread:$0]  %s493_s0, 256, %s407_s18, [#allocation4], %s373_s1, %s373_s1, %s374_s12  }
  0x25   :  { %s375_s15 = smov [#allocation8]   ;;  %s376_s17 = smov [#allocation9]  }
  0x26   :  { %s41_s16 = sshll.u32 %s375_s15, 4  ;;  %s50_s19 = sshll.u32 %s376_s17, 4  ;;  %s42_s16 = int_to_ptr.vmem [resolvable:$true] %s41_s16  ;;  %s438_s19 = int_to_ptr.vmem [resolvable:$true] %s50_s19 }
  0x27   :  { %s297_s22 = scalar_lea.hbm %s495_s2, 16 }
  0x28   :  { %p298_p2 = scmp.ne.s32.totalorder %s495_s2, %s297_s22  ;;  %p301_p3 = scmp.lt.u32.totalorder %s297_s22, %s495_s2 }
  0x2a   :  { %p303_p4 = pnand %p301_p3, %p298_p2 }
  0x2c   :  { %306 = shalt.err (!%p303_p4)
}
  0x2d   :  { %s307_s0 = scalar_lea.vmem %s42_s16, 16  ;;  %s311_s18 = scalar_lea.vmem %s42_s16, 32 }
  0x2e   :  { %p308_p5 = scmp.ne.s32.totalorder %s42_s16, %s307_s0  ;;  %p312_p6 = scmp.lt.s32.totalorder %s42_s16, %s42_s16 }
  0x2f   :  { %p313_p7 = scmp.lt.s32.totalorder %s311_s18, %s307_s0 }
  0x31   :  { %p314_p8 = por %p313_p7, %p312_p6 }
  0x33   :  { %p315_p9 = pnand %p314_p8, %p308_p5 }
  0x35   :  { %318 = shalt.err (!%p315_p9)
}
  0x36   :  { %44 = dma.hbm_to_vmem [thread:$0]  %s495_s2, 16, %s42_s16, [#allocation7]  }
  0x37   :  { %s319_s5 = scalar_lea.hbm %s496_s3, 256 }
  0x38   :  { %p320_p10 = scmp.ne.s32.totalorder %s496_s3, %s319_s5  ;;  %p323_p11 = scmp.lt.u32.totalorder %s319_s5, %s496_s3 }
  0x3a   :  { %p325_p12 = pnand %p323_p11, %p320_p10 }
  0x3c   :  { %328 = shalt.err (!%p325_p12)
}
  0x3d   :  { %s329_s10 = scalar_lea.vmem %s438_s19, 256  ;;  %p334_p0 = scmp.lt.s32.totalorder %s438_s19, %s438_s19 }
  0x3e   :  { %p330_p13 = scmp.ne.s32.totalorder %s438_s19, %s329_s10  ;;  %p335_p1 = scmp.lt.s32.totalorder %s329_s10, %s329_s10 }
  0x40   :  { %p336_p2 = por %p335_p1, %p334_p0 }
  0x42   :  { %p337_p3 = pnand %p336_p2, %p330_p13 }
  0x44   :  { %340 = shalt.err (!%p337_p3)
}
  0x45   :  { %s377_s2 = smov 64   ;;  %s378_s11 = smov 4  }
  0x46   :  { %56 = dma.hbm_to_vmem [thread:$0]  %s496_s3, 256, %s438_s19, [#allocation10], %s377_s2, %s377_s2, %s378_s11  }
  0x47   :  { %363 = dma.done.wait [#allocation4], 256  }
  0x48   :  { %364 = vsyncadd [#allocation4], 4294967040 }
  0x49   :  { %365 = dma.done.wait [#allocation7], 32  }
  0x4a   :  { %366 = vsyncadd [#allocation7], 4294967264 }
  0x4b   :  { %367 = dma.done.wait [#allocation10], 256  }
  0x4c   :  { %368 = vsyncadd [#allocation10], 4294967040  ;;  %vm76_vm0 = vcmask 261120   ;;  %v74_v0 = vld [vmem:[#allocation3] sm:$0xff]  ;;  %v75_v1 = vld [vmem:[#allocation3 + $0x8] sm:$0xff]  ;;  %v379_v15 = vmov 0.0  }
  0x4d   :  { %v77_v2 = vsel %vm76_vm0, %v74_v0, 0.0  ;;  %v80_v3 = vsel %vm76_vm0, %v75_v1, 0.0  ;;  %v247_v14 = vld [vmem:[#allocation9] sm:$0xff]   ;;  %228 = vmatprep.subr.bf16.mxu0 %v379_v15  ;;  %v248_v16 = vld [vmem:[#allocation9 + $0x8] sm:$0xff]   ;;  %vm380_vm1 = vmmov 0   ;;  %vm194_vm2 = vcmask 781312  }
  0x4e   :  { %78 = vadd.xlane.f32.xlu0 %v77_v2  ;;  %229 = vmatpush3.bf16.msra.mxu0 %v247_v14  ;;  %v216_v25 = vld [vmem:[#allocation6] ss:$0 sm:$0xff]  ;;  %v217_v29 = vld [vmem:[#allocation8] ss:$0 sm:$0xff]  ;;  %s381_s3 = smov [#allocation11]  }
  0x4f   :  { %232 = vmatprep.mubr.msk.bf16.mxu0 %vm380_vm1, %v379_v15  ;;  %230 = vmatprep.subr.bf16.mxu0 %v379_v15  ;;  %s202_s13 = sshll.u32 %s381_s3, 4  ;;  %s203_s13 = int_to_ptr.vmem [resolvable:$true] %s202_s13 }
  0x50   :  { %s341_s14 = scalar_lea.vmem %s203_s13, 128  ;;  %p346_p5 = scmp.lt.s32.totalorder %s203_s13, %s203_s13 }
  0x51   :  { %p342_p4 = scmp.ne.s32.totalorder %s203_s13, %s341_s14  ;;  %p347_p6 = scmp.lt.s32.totalorder %s341_s14, %s341_s14 }
  0x52   :  { %81 = vadd.xlane.f32.xlu0 %v80_v3  ;;  %231 = vmatpush3.bf16.msra.mxu0 %v248_v16 }
  0x53   :  { %p348_p7 = por %p347_p6, %p346_p5 }
  0x55   :  { %p349_p8 = pnand %p348_p7, %p342_p4 }
  0xdb   :  { %v79_v4 = vpop.xlane.xlu0 %78 }
  0xdc   :  { %v84_v5 = vmul.f32 0.03125, %v79_v4 }
  0xde   :  { %v86_v6 = vsub.f32 %v74_v0, %v84_v5 }
  0xdf   :  { %v82_v7 = vpop.xlane.xlu0 %81 }
  0xe0   :  { %v85_v8 = vmul.f32 0.03125, %v82_v7  ;;  %v88_v9 = vmul.f32 %v86_v6, %v86_v6 }
  0xe2   :  { %v87_v10 = vsub.f32 %v75_v1, %v85_v8  ;;  %v90_v11 = vsel %vm76_vm0, %v88_v9, 0.0 }
  0xe3   :  { %91 = vadd.xlane.f32.xlu1 %v90_v11 }
  0xe4   :  { %v89_v12 = vmul.f32 %v87_v10, %v87_v10 }
  0xe6   :  { %v93_v13 = vsel %vm76_vm0, %v89_v12, 0.0 }
  0xe7   :  { %94 = vadd.xlane.f32.xlu1 %v93_v13 }
 0x170   :  { %v92_v17 = vpop.xlane.xlu1 %91 }
 0x171   :  { %v96_v18 = vmul.f32 0.03125, %v92_v17 }
 0x173   :  { %v98_v19 = vadd.f32 1e-05, %v96_v18 }
 0x174   :  { %v95_v20 = vpop.xlane.xlu1 %94 }
 0x175   :  { %249 = vrsqrt.f32 %v98_v19  ;;  %v97_v21 = vmul.f32 0.03125, %v95_v20 }
 0x177   :  { %v99_v22 = vadd.f32 1e-05, %v97_v21 }
 0x179   :  { %251 = vrsqrt.f32 %v99_v22 }
 0x17f   :  { %v250_v23 = vpop.eup %249 }
 0x180   :  { %v102_v24 = vmul.f32 %v250_v23, %v86_v6 }
 0x182   :  { %v111_v27 = vmul.f32 %v216_v25, %v102_v24 }
 0x183   :  { %v252_v26 = vpop.eup %251 }
 0x184   :  { %v103_v28 = vmul.f32 %v252_v26, %v87_v10  ;;  %v120_v31 = vadd.f32 %v217_v29, %v111_v27 }
 0x186   :  { %v112_v30 = vmul.f32 %v216_v25, %v103_v28 }
 0x188   :  { %v121_v32 = vadd.f32 %v217_v29, %v112_v30 }
 0x18a   :  { %v122_v33 = vpack.c.bf16 %v121_v32, %v120_v31 }
 0x18c   :  { %123 = vst.msk [vmem:[#allocation2] sm:$0xff] %vm76_vm0, %v122_v33 }
 0x193   :  { %v124_v34 = vld [vmem:[#allocation2] sm:$0xff] }
 0x194   :  { %233 = vmatmul.mubr.msk.bf16.vlgmr.msra.gmra.mrb[0].mxu0 %vm76_vm0, %v124_v34 }
 0x267   :  { %v179_v35 = vpop.f32.mrb[0].mxu0 }
 0x268   :  { %v223_v36 = vpack.c.bf16 %v179_v35, %v179_v35  ;;  %v234_v37 = vpop.f32.mrb[1].mxu0 }
 0x269   :  { %v182_v38 = vpop.f32.mrb[2].mxu0 }
 0x26a   :  { %v224_v39 = vpack.c.bf16 %v182_v38, %v182_v38  ;;  %v235_v40 = vpop.f32.mrb[3].mxu0  ;;  %195 = vst.msk [vmem:[#allocation11] sm:$0xf] %vm194_vm2, %v223_v36 }
 0x26c   :  { %196 = vst.msk [vmem:[#allocation11 + $0x4] sm:$0xf] %vm194_vm2, %v224_v39 }
 0x26d   :  { %352 = shalt.err (!%p349_p8)
}
 0x26e   :  { %s353_s17 = scalar_lea.hbm %s497_s4, 128 }
 0x26f   :  { %p354_p9 = scmp.ne.s32.totalorder %s497_s4, %s353_s17  ;;  %p357_p10 = scmp.lt.u32.totalorder %s353_s17, %s497_s4 }
 0x271   :  { %p359_p11 = pnand %p357_p10, %p354_p9 }
 0x273   :  { %362 = shalt.err (!%p359_p11)
}
 0x274   :  { %208 = dma.vmem_to_hbm [thread:$0]  %s203_s13, 128, %s497_s4, [#allocation5], %s377_s2, %s377_s2, %s378_s11  }
 0x275   :  { %369 = dma.done.wait [#allocation5], 128  }
 0x276   :  { %370 = vsyncadd [#allocation5], 4294967168 }
 0x277   :  { %212 = vsyncpa [#allocation4], 1 }
 0x278   :  { %213 = vsyncpa [#allocation7], 1 }
 0x279   :  { %214 = vsyncpa [#allocation10], 1 }
 0x27a   :  { %215 = vsyncpa [#allocation5], 1 }

// kernel: block_forward.7
= control target key start
LH: loop header
LB: loop body
LE: loop exit
PB: predicated region body
PF: predicated region fallthrough
CT: control target
= control target key end

     0   :  { %8 = vsyncpa [#allocation3], 0  ;;  %s362_s0 = inlined_call_operand.hbm [shape: bf16[16,32], index: 0, kind: input, shape index: {}]   ;;  %s363_s1 = inlined_call_operand.hbm [shape: bf16[32,32], index: 1, kind: input, shape index: {}]   ;;  %s364_s2 = inlined_call_operand.hbm [shape: f32[16,32], index: 2, kind: input, shape index: {}]   ;;  %s365_s3 = inlined_call_operand.hbm [shape: f32[16,32], index: 3, kind: output, shape index: {}]  }
   0x1   :  { %9 = vsyncpa [#allocation6], 0 }
   0x2   :  { %10 = vsyncpa [#allocation4], 0  ;;  %s271_s12 = smov [#allocation5]   ;;  %s272_s14 = smov [#allocation2]  }
   0x3   :  { %s28_s13 = sshll.u32 %s271_s12, 4  ;;  %s16_s15 = sshll.u32 %s272_s14, 4  ;;  %s29_s13 = int_to_ptr.vmem [resolvable:$true] %s28_s13  ;;  %s301_s15 = int_to_ptr.vmem [resolvable:$true] %s16_s15 }
   0x4   :  { %s177_s18 = scalar_lea.hbm %s363_s1, 256 }
   0x5   :  { %p178_p0 = scmp.ne.s32.totalorder %s363_s1, %s177_s18  ;;  %p181_p1 = scmp.lt.u32.totalorder %s177_s18, %s363_s1 }
   0x7   :  { %p183_p2 = pnand %p181_p1, %p178_p0 }
   0x9   :  { %186 = shalt.err (!%p183_p2)
}
   0xa   :  { %s187_s23 = scalar_lea.vmem %s29_s13, 256  ;;  %p192_p4 = scmp.lt.s32.totalorder %s29_s13, %s29_s13 }
   0xb   :  { %p188_p3 = scmp.ne.s32.totalorder %s29_s13, %s187_s23  ;;  %p193_p5 = scmp.lt.s32.totalorder %s187_s23, %s187_s23 }
   0xd   :  { %p194_p6 = por %p193_p5, %p192_p4 }
   0xf   :  { %p195_p7 = pnand %p194_p6, %p188_p3 }
  0x11   :  { %198 = shalt.err (!%p195_p7)
}
  0x12   :  { %s273_s24 = smov 64   ;;  %s274_s25 = smov 4  }
  0x13   :  { %34 = dma.hbm_to_vmem [thread:$0]  %s363_s1, 256, %s29_s13, [#allocation6], %s273_s24, %s273_s24, %s274_s25  }
  0x14   :  { %s199_s30 = scalar_lea.hbm %s362_s0, 128 }
  0x15   :  { %p200_p8 = scmp.ne.s32.totalorder %s362_s0, %s199_s30  ;;  %p203_p9 = scmp.lt.u32.totalorder %s199_s30, %s362_s0 }
  0x17   :  { %p205_p10 = pnand %p203_p9, %p200_p8 }
  0x19   :  { %208 = shalt.err (!%p205_p10)
}
  0x1a   :  { %s209_s8 = scalar_lea.vmem %s301_s15, 128  ;;  %p214_p12 = scmp.lt.s32.totalorder %s301_s15, %s301_s15 }
  0x1b   :  { %p210_p11 = scmp.ne.s32.totalorder %s301_s15, %s209_s8  ;;  %p215_p13 = scmp.lt.s32.totalorder %s209_s8, %s209_s8 }
  0x1d   :  { %p216_p0 = por %p215_p13, %p214_p12 }
  0x1f   :  { %p217_p1 = pnand %p216_p0, %p210_p11 }
  0x21   :  { %220 = shalt.err (!%p217_p1)
}
  0x22   :  { %22 = dma.hbm_to_vmem [thread:$0]  %s362_s0, 128, %s301_s15, [#allocation3], %s273_s24, %s273_s24, %s274_s25  }
  0x23   :  { %s275_s10 = smov [#allocation7]   ;;  %s221_s14 = scalar_lea.hbm %s364_s2, 256 }
  0x24   :  { %s40_s11 = sshll.u32 %s275_s10, 4  ;;  %p222_p2 = scmp.ne.s32.totalorder %s364_s2, %s221_s14  ;;  %s41_s11 = int_to_ptr.vmem [resolvable:$true] %s40_s11 }
  0x25   :  { %p225_p3 = scmp.lt.u32.totalorder %s221_s14, %s364_s2 }
  0x27   :  { %p227_p4 = pnand %p225_p3, %p222_p2 }
  0x29   :  { %230 = shalt.err (!%p227_p4)
}
  0x2a   :  { %s231_s20 = scalar_lea.vmem %s41_s11, 256  ;;  %p236_p6 = scmp.lt.s32.totalorder %s41_s11, %s41_s11 }
  0x2b   :  { %p232_p5 = scmp.ne.s32.totalorder %s41_s11, %s231_s20  ;;  %p237_p7 = scmp.lt.s32.totalorder %s231_s20, %s231_s20 }
  0x2d   :  { %p238_p8 = por %p237_p7, %p236_p6 }
  0x2f   :  { %p239_p9 = pnand %p238_p8, %p232_p5 }
  0x31   :  { %242 = shalt.err (!%p239_p9)
}
  0x32   :  { %s276_s0 = smov 128   ;;  %s277_s15 = smov 8  }
  0x33   :  { %46 = dma.hbm_to_vmem [thread:$0]  %s364_s2, 256, %s41_s11, [#allocation6], %s276_s0, %s276_s0, %s277_s15  }
  0x34   :  { %265 = dma.done.wait [#allocation3], 128  }
  0x35   :  { %266 = vsyncadd [#allocation3], 4294967168 }
  0x36   :  { %267 = dma.done.wait [#allocation6], 512  }
  0x37   :  { %268 = vsyncadd [#allocation6], 4294966784  ;;  %v278_v0 = vmov 0.0   ;;  %vm279_vm0 = vmmov 0   ;;  %v174_v1 = vld [vmem:[#allocation5] sm:$0xff]   ;;  %v175_v2 = vld [vmem:[#allocation5 + $0x8] sm:$0xff]  }
  0x38   :  { %156 = vmatprep.subr.bf16.mxu0 %v278_v0  ;;  %160 = vmatprep.mubr.msk.bf16.mxu0 %vm279_vm0, %v278_v0  ;;  %v176_v3 = vld [vmem:[#allocation2] sm:$0xff]   ;;  %vm82_vm1 = vcmask 261120   ;;  %v57_v4 = vld [vmem:[#allocation7] sm:$0xff]  ;;  %s280_s2 = smov [#allocation8]  }
  0x39   :  { %157 = vmatpush3.bf16.msra.mxu0 %v174_v1  ;;  %v58_v6 = vld [vmem:[#allocation7 + $0x8] sm:$0xff]  ;;  %s136_s23 = sshll.u32 %s280_s2, 4  ;;  %s137_s23 = int_to_ptr.vmem [resolvable:$true] %s136_s23 }
  0x3a   :  { %158 = vmatprep.subr.bf16.mxu0 %v278_v0  ;;  %s243_s24 = scalar_lea.vmem %s137_s23, 256  ;;  %p248_p11 = scmp.lt.s32.totalorder %s137_s23, %s137_s23 }
  0x3b   :  { %p244_p10 = scmp.ne.s32.totalorder %s137_s23, %s243_s24  ;;  %p249_p12 = scmp.lt.s32.totalorder %s243_s24, %s243_s24 }
  0x3d   :  { %159 = vmatpush3.bf16.msra.mxu0 %v175_v2  ;;  %p250_p13 = por %p249_p12, %p248_p11 }
  0x3f   :  { %p251_p0 = pnand %p250_p13, %p244_p10 }
  0x40   :  { %161 = vmatmul.mubr.msk.bf16.vlgmr.msra.gmra.mrb[0].mxu0 %vm82_vm1, %v176_v3 }
 0x113   :  { %v120_v5 = vpop.f32.mrb[0].mxu0 }
 0x114   :  { %v127_v7 = vadd.f32 %v120_v5, %v57_v4  ;;  %v162_v8 = vpop.f32.mrb[1].mxu0 }
 0x115   :  { %v123_v9 = vpop.f32.mrb[2].mxu0 }
 0x116   :  { %129 = vst.msk [vmem:[#allocation8] sm:$0xff] %vm82_vm1, %v127_v7  ;;  %v128_v10 = vadd.f32 %v123_v9, %v58_v6  ;;  %v163_v11 = vpop.f32.mrb[3].mxu0 }
 0x118   :  { %130 = vst.msk [vmem:[#allocation8 + $0x8] sm:$0xff] %vm82_vm1, %v128_v10 }
 0x119   :  { %254 = shalt.err (!%p251_p0)
}
 0x11a   :  { %s255_s27 = scalar_lea.hbm %s365_s3, 256 }
 0x11b   :  { %p256_p1 = scmp.ne.s32.totalorder %s365_s3, %s255_s27  ;;  %p259_p2 = scmp.lt.u32.totalorder %s255_s27, %s365_s3 }
 0x11d   :  { %p261_p3 = pnand %p259_p2, %p256_p1 }
 0x11f   :  { %264 = shalt.err (!%p261_p3)
}
 0x120   :  { %142 = dma.vmem_to_hbm [thread:$0]  %s137_s23, 256, %s365_s3, [#allocation4], %s276_s0, %s276_s0, %s277_s15  }
 0x121   :  { %269 = dma.done.wait [#allocation4], 256  }
 0x122   :  { %270 = vsyncadd [#allocation4], 4294967040 }
 0x123   :  { %146 = vsyncpa [#allocation3], 1 }
 0x124   :  { %147 = vsyncpa [#allocation6], 1 }
 0x125   :  { %148 = vsyncpa [#allocation4], 1 }

// kernel: block_forward.8
= control target key start
LH: loop header
LB: loop body
LE: loop exit
PB: predicated region body
PF: predicated region fallthrough
CT: control target
= control target key end

     0   :  { %12 = vsyncpa [#allocation3], 0  ;;  %s611_s0 = inlined_call_operand.hbm [shape: f32[16,32], index: 0, kind: input, shape index: {}]   ;;  %s612_s1 = inlined_call_operand.hbm [shape: f32[1,32], index: 1, kind: input, shape index: {}]   ;;  %s613_s2 = inlined_call_operand.hbm [shape: f32[1,32], index: 2, kind: input, shape index: {}]   ;;  %s614_s3 = inlined_call_operand.hbm [shape: bf16[32,8], index: 3, kind: input, shape index: {}]   ;;  %s615_s4 = inlined_call_operand.hbm [shape: f32[1,8], index: 4, kind: input, shape index: {}]   ;;  %s616_s5 = inlined_call_operand.hbm [shape: bf16[16,32], index: 5, kind: output, shape index: {0}]   ;;  %s617_s6 = inlined_call_operand.hbm [shape: f32[16,8], index: 6, kind: output, shape index: {1}]  }
   0x1   :  { %13 = vsyncpa [#allocation6], 0 }
   0x2   :  { %14 = vsyncpa [#allocation9], 0 }
   0x3   :  { %15 = vsyncpa [#allocation4], 0 }
   0x4   :  { %16 = vsyncpa [#allocation13], 0  ;;  %s455_s21 = smov [#allocation5]   ;;  %s456_s23 = smov [#allocation8]  }
   0x5   :  { %s35_s22 = sshll.u32 %s455_s21, 4  ;;  %s54_s24 = sshll.u32 %s456_s23, 4  ;;  %s36_s22 = int_to_ptr.vmem [resolvable:$true] %s35_s22  ;;  %s503_s24 = int_to_ptr.vmem [resolvable:$true] %s54_s24 }
   0x6   :  { %s291_s27 = scalar_lea.hbm %s612_s1, 16 }
   0x7   :  { %p292_p0 = scmp.ne.s32.totalorder %s612_s1, %s291_s27  ;;  %p295_p1 = scmp.lt.u32.totalorder %s291_s27, %s612_s1 }
   0x9   :  { %p297_p2 = pnand %p295_p1, %p292_p0 }
   0xb   :  { %300 = shalt.err (!%p297_p2)
}
   0xc   :  { %s301_s8 = scalar_lea.vmem %s36_s22, 16  ;;  %s305_s9 = scalar_lea.vmem %s36_s22, 32 }
   0xd   :  { %p302_p3 = scmp.ne.s32.totalorder %s36_s22, %s301_s8  ;;  %p306_p4 = scmp.lt.s32.totalorder %s36_s22, %s36_s22 }
   0xe   :  { %p307_p5 = scmp.lt.s32.totalorder %s305_s9, %s301_s8 }
  0x10   :  { %p308_p6 = por %p307_p5, %p306_p4 }
  0x12   :  { %p309_p7 = pnand %p308_p6, %p302_p3 }
  0x14   :  { %312 = shalt.err (!%p309_p7)
}
  0x15   :  { %38 = dma.hbm_to_vmem [thread:$0]  %s612_s1, 16, %s36_s22, [#allocation6]  }
  0x16   :  { %s313_s14 = scalar_lea.hbm %s614_s3, 256 }
  0x17   :  { %p314_p8 = scmp.ne.s32.totalorder %s614_s3, %s313_s14  ;;  %p317_p9 = scmp.lt.u32.totalorder %s313_s14, %s614_s3 }
  0x19   :  { %p319_p10 = pnand %p317_p9, %p314_p8 }
  0x1b   :  { %322 = shalt.err (!%p319_p10)
}
  0x1c   :  { %s323_s19 = scalar_lea.vmem %s503_s24, 256  ;;  %p328_p12 = scmp.lt.s32.totalorder %s503_s24, %s503_s24 }
  0x1d   :  { %p324_p11 = scmp.ne.s32.totalorder %s503_s24, %s323_s19  ;;  %p329_p13 = scmp.lt.s32.totalorder %s323_s19, %s323_s19 }
  0x1f   :  { %p330_p0 = por %p329_p13, %p328_p12 }
  0x21   :  { %p331_p1 = pnand %p330_p0, %p324_p11 }
  0x23   :  { %334 = shalt.err (!%p331_p1)
}
  0x24   :  { %s457_s1 = smov 64   ;;  %s458_s20 = smov 4  }
  0x25   :  { %60 = dma.hbm_to_vmem [thread:$0]  %s614_s3, 256, %s503_s24, [#allocation9], %s457_s1, %s457_s1, %s458_s20  }
  0x26   :  { %s459_s23 = smov [#allocation2]   ;;  %s335_s28 = scalar_lea.hbm %s611_s0, 256 }
  0x27   :  { %s22_s25 = sshll.u32 %s459_s23, 4  ;;  %p336_p2 = scmp.ne.s32.totalorder %s611_s0, %s335_s28  ;;  %s23_s25 = int_to_ptr.vmem [resolvable:$true] %s22_s25 }
  0x28   :  { %p339_p3 = scmp.lt.u32.totalorder %s335_s28, %s611_s0 }
  0x2a   :  { %p341_p4 = pnand %p339_p3, %p336_p2 }
  0x2c   :  { %344 = shalt.err (!%p341_p4)
}
  0x2d   :  { %s345_s9 = scalar_lea.vmem %s23_s25, 256  ;;  %p350_p6 = scmp.lt.s32.totalorder %s23_s25, %s23_s25 }
  0x2e   :  { %p346_p5 = scmp.ne.s32.totalorder %s23_s25, %s345_s9  ;;  %p351_p7 = scmp.lt.s32.totalorder %s345_s9, %s345_s9 }
  0x30   :  { %p352_p8 = por %p351_p7, %p350_p6 }
  0x32   :  { %p353_p9 = pnand %p352_p8, %p346_p5 }
  0x34   :  { %356 = shalt.err (!%p353_p9)
}
  0x35   :  { %s460_s3 = smov 128   ;;  %s461_s24 = smov 8  }
  0x36   :  { %28 = dma.hbm_to_vmem [thread:$0]  %s611_s0, 256, %s23_s25, [#allocation3], %s460_s3, %s460_s3, %s461_s24  }
  0x37   :  { %s462_s12 = smov [#allocation7]   ;;  %s463_s14 = smov [#allocation10]  }
  0x38   :  { %s45_s13 = sshll.u32 %s462_s12, 4  ;;  %s67_s15 = sshll.u32 %s463_s14, 4  ;;  %s46_s13 = int_to_ptr.vmem [resolvable:$true] %s45_s13  ;;  %s68_s15 = int_to_ptr.vmem [resolvable:$true] %s67_s15 }
  0x39   :  { %s357_s18 = scalar_lea.hbm %s613_s2, 16 }
  0x3a   :  { %p358_p10 = scmp.ne.s32.totalorder %s613_s2, %s357_s18  ;;  %p361_p11 = scmp.lt.u32.totalorder %s357_s18, %s613_s2 }
  0x3c   :  { %p363_p12 = pnand %p361_p11, %p358_p10 }
  0x3e   :  { %366 = shalt.err (!%p363_p12)
}
  0x3f   :  { %s367_s0 = scalar_lea.vmem %s46_s13, 16  ;;  %s371_s25 = scalar_lea.vmem %s46_s13, 32 }
  0x40   :  { %p368_p13 = scmp.ne.s32.totalorder %s46_s13, %s367_s0  ;;  %p372_p0 = scmp.lt.s32.totalorder %s46_s13, %s46_s13 }
  0x41   :  { %p373_p1 = scmp.lt.s32.totalorder %s371_s25, %s367_s0 }
  0x43   :  { %p374_p2 = por %p373_p1, %p372_p0 }
  0x45   :  { %p375_p3 = pnand %p374_p2, %p368_p13 }
  0x47   :  { %378 = shalt.err (!%p375_p3)
}
  0x48   :  { %48 = dma.hbm_to_vmem [thread:$0]  %s613_s2, 16, %s46_s13, [#allocation6]  }
  0x49   :  { %s379_s30 = scalar_lea.hbm %s615_s4, 16 }
  0x4a   :  { %p380_p4 = scmp.ne.s32.totalorder %s615_s4, %s379_s30  ;;  %p383_p5 = scmp.lt.u32.totalorder %s379_s30, %s615_s4 }
  0x4c   :  { %p385_p6 = pnand %p383_p5, %p380_p4 }
  0x4e   :  { %388 = shalt.err (!%p385_p6)
}
  0x4f   :  { %s389_s11 = scalar_lea.vmem %s68_s15, 16  ;;  %s393_s12 = scalar_lea.vmem %s68_s15, 32 }
  0x50   :  { %p390_p7 = scmp.ne.s32.totalorder %s68_s15, %s389_s11  ;;  %p394_p8 = scmp.lt.s32.totalorder %s68_s15, %s68_s15 }
  0x51   :  { %p395_p9 = scmp.lt.s32.totalorder %s393_s12, %s389_s11 }
  0x53   :  { %p396_p10 = por %p395_p9, %p394_p8 }
  0x55   :  { %p397_p11 = pnand %p396_p10, %p390_p7 }
  0x57   :  { %400 = shalt.err (!%p397_p11)
}
  0x58   :  { %70 = dma.hbm_to_vmem [thread:$0]  %s615_s4, 16, %s68_s15, [#allocation9]  }
  0x59   :  { %445 = dma.done.wait [#allocation3], 256  }
  0x5a   :  { %446 = vsyncadd [#allocation3], 4294967040 }
  0x5b   :  { %447 = dma.done.wait [#allocation6], 32  }
  0x5c   :  { %448 = vsyncadd [#allocation6], 4294967264 }
  0x5d   :  { %449 = dma.done.wait [#allocation9], 272  }
  0x5e   :  { %450 = vsyncadd [#allocation9], 4294967024  ;;  %vm89_vm0 = vcmask 261120   ;;  %v87_v0 = vld [vmem:[#allocation2] sm:$0xff]  ;;  %v88_v1 = vld [vmem:[#allocation2 + $0x8] sm:$0xff]  ;;  %v464_v15 = vmov 0.0  }
  0x5f   :  { %v90_v2 = vsel %vm89_vm0, %v87_v0, 0.0  ;;  %v93_v3 = vsel %vm89_vm0, %v88_v1, 0.0  ;;  %v285_v14 = vld [vmem:[#allocation8] sm:$0xff]   ;;  %264 = vmatprep.subr.bf16.mxu0 %v464_v15  ;;  %v286_v16 = vld [vmem:[#allocation8 + $0x8] sm:$0xff]   ;;  %vm465_vm1 = vmmov 0   ;;  %vm143_vm2 = vcmask 257024  }
  0x60   :  { %91 = vadd.xlane.f32.xlu0 %v90_v2  ;;  %265 = vmatpush3.bf16.msra.mxu0 %v285_v14  ;;  %v251_v24 = vld [vmem:[#allocation5] ss:$0 sm:$0xff]  ;;  %v252_v26 = vld [vmem:[#allocation7] ss:$0 sm:$0xff]  ;;  %s466_s4 = smov [#allocation11]  }
  0x61   :  { %268 = vmatprep.mubr.msk.bf16.mxu0 %vm465_vm1, %v464_v15  ;;  %266 = vmatprep.subr.bf16.mxu0 %v464_v15  ;;  %s221_s14 = sshll.u32 %s466_s4, 4  ;;  %s222_s14 = int_to_ptr.vmem [resolvable:$true] %s221_s14 }
  0x62   :  { %s401_s15 = scalar_lea.vmem %s222_s14, 128  ;;  %p406_p13 = scmp.lt.s32.totalorder %s222_s14, %s222_s14 }
  0x63   :  { %p402_p12 = scmp.ne.s32.totalorder %s222_s14, %s401_s15  ;;  %p407_p0 = scmp.lt.s32.totalorder %s401_s15, %s401_s15 }
  0x64   :  { %94 = vadd.xlane.f32.xlu0 %v93_v3  ;;  %267 = vmatpush3.bf16.msra.mxu0 %v286_v16 }
  0x65   :  { %p408_p1 = por %p407_p0, %p406_p13 }
  0x67   :  { %p409_p2 = pnand %p408_p1, %p402_p12 }
  0xed   :  { %v92_v4 = vpop.xlane.xlu0 %91 }
  0xee   :  { %v97_v5 = vmul.f32 0.03125, %v92_v4 }
  0xf0   :  { %v99_v6 = vsub.f32 %v87_v0, %v97_v5 }
  0xf1   :  { %v95_v7 = vpop.xlane.xlu0 %94 }
  0xf2   :  { %v98_v8 = vmul.f32 0.03125, %v95_v7  ;;  %v101_v9 = vmul.f32 %v99_v6, %v99_v6 }
  0xf4   :  { %v100_v10 = vsub.f32 %v88_v1, %v98_v8  ;;  %v103_v11 = vsel %vm89_vm0, %v101_v9, 0.0 }
  0xf5   :  { %104 = vadd.xlane.f32.xlu1 %v103_v11 }
  0xf6   :  { %v102_v12 = vmul.f32 %v100_v10, %v100_v10 }
  0xf8   :  { %v106_v13 = vsel %vm89_vm0, %v102_v12, 0.0 }
  0xf9   :  { %107 = vadd.xlane.f32.xlu1 %v106_v13 }
 0x182   :  { %v105_v17 = vpop.xlane.xlu1 %104 }
 0x183   :  { %v109_v18 = vmul.f32 0.03125, %v105_v17 }
 0x185   :  { %v111_v19 = vadd.f32 1e-05, %v109_v18 }
 0x186   :  { %v108_v20 = vpop.xlane.xlu1 %107 }
 0x187   :  { %287 = vrsqrt.f32 %v111_v19  ;;  %v110_v21 = vmul.f32 0.03125, %v108_v20 }
 0x189   :  { %v112_v22 = vadd.f32 1e-05, %v110_v21 }
 0x18b   :  { %289 = vrsqrt.f32 %v112_v22 }
 0x191   :  { %v288_v23 = vpop.eup %287 }
 0x192   :  { %v115_v25 = vmul.f32 %v288_v23, %v99_v6 }
 0x194   :  { %v124_v27 = vmul.f32 %v251_v24, %v115_v25 }
 0x195   :  { %v290_v28 = vpop.eup %289 }
 0x196   :  { %v116_v29 = vmul.f32 %v290_v28, %v100_v10  ;;  %v133_v30 = vadd.f32 %v252_v26, %v124_v27 }
 0x198   :  { %v125_v31 = vmul.f32 %v251_v24, %v116_v29  ;;  %v259_v32 = vpack.c.bf16 %v133_v30, %v133_v30 }
 0x19a   :  { %v134_v33 = vadd.f32 %v252_v26, %v125_v31  ;;  %144 = vst.msk [vmem:[#allocation11] sm:$0xf] %vm143_vm2, %v259_v32 }
 0x19c   :  { %v135_v34 = vpack.c.bf16 %v134_v33, %v133_v30  ;;  %v260_v35 = vpack.c.bf16 %v134_v33, %v134_v33 }
 0x19e   :  { %269 = vmatmul.mubr.msk.bf16.vlgmr.msra.gmra.mrb[0].mxu0 %vm89_vm0, %v135_v34  ;;  %145 = vst.msk [vmem:[#allocation11 + $0x4] sm:$0xf] %vm143_vm2, %v260_v35 }
 0x19f   :  { %412 = shalt.err (!%p409_p2)
}
 0x1a0   :  { %s413_s18 = scalar_lea.hbm %s616_s5, 128 }
 0x1a1   :  { %p414_p3 = scmp.ne.s32.totalorder %s616_s5, %s413_s18  ;;  %p417_p4 = scmp.lt.u32.totalorder %s413_s18, %s616_s5 }
 0x1a3   :  { %p419_p5 = pnand %p417_p4, %p414_p3 }
 0x1a5   :  { %422 = shalt.err (!%p419_p5)
}
 0x1a6   :  { %227 = dma.vmem_to_hbm [thread:$0]  %s222_s14, 128, %s616_s5, [#allocation4], %s457_s1, %s457_s1, %s458_s20   ;;  %v255_v36 = vld [vmem:[#allocation10] ss:$0 sm:$0xff]  ;;  %vm213_vm3 = vcmask 64512  }
 0x1a7   :  { %s467_s26 = smov [#allocation12]  }
 0x1a8   :  { %s233_s27 = sshll.u32 %s467_s26, 4  ;;  %s234_s27 = int_to_ptr.vmem [resolvable:$true] %s233_s27 }
 0x1a9   :  { %s423_s28 = scalar_lea.vmem %s234_s27, 256  ;;  %p428_p7 = scmp.lt.s32.totalorder %s234_s27, %s234_s27 }
 0x1aa   :  { %p424_p6 = scmp.ne.s32.totalorder %s234_s27, %s423_s28  ;;  %p429_p8 = scmp.lt.s32.totalorder %s423_s28, %s423_s28 }
 0x1ac   :  { %p430_p9 = por %p429_p8, %p428_p7 }
 0x1ae   :  { %p431_p10 = pnand %p430_p9, %p424_p6 }
 0x271   :  { %v206_v37 = vpop.f32.mrb[0].mxu0 }
 0x272   :  { %v207_v38 = vadd.f32 %v255_v36, %v206_v37  ;;  %v270_v39 = vpop.f32.mrb[1].mxu0 }
 0x273   :  { %v209_v40 = vpop.f32.mrb[2].mxu0 }
 0x274   :  { %v210_v41 = vadd.f32 %v255_v36, %v209_v40  ;;  %v271_v42 = vpop.f32.mrb[3].mxu0  ;;  %214 = vst.msk [vmem:[#allocation12] sm:$0xff] %vm213_vm3, %v207_v38 }
 0x276   :  { %215 = vst.msk [vmem:[#allocation12 + $0x8] sm:$0xff] %vm213_vm3, %v210_v41 }
 0x277   :  { %434 = shalt.err (!%p431_p10)
}
 0x278   :  { %s435_s20 = scalar_lea.hbm %s617_s6, 256 }
 0x279   :  { %p436_p11 = scmp.ne.s32.totalorder %s617_s6, %s435_s20  ;;  %p439_p12 = scmp.lt.u32.totalorder %s435_s20, %s617_s6 }
 0x27b   :  { %p441_p13 = pnand %p439_p12, %p436_p11 }
 0x27d   :  { %444 = shalt.err (!%p441_p13)
}
 0x27e   :  { %239 = dma.vmem_to_hbm [thread:$0]  %s234_s27, 256, %s617_s6, [#allocation13], %s460_s3, %s460_s3, %s461_s24  }
 0x27f   :  { %451 = dma.done.wait [#allocation4], 128  }
 0x280   :  { %452 = vsyncadd [#allocation4], 4294967168 }
 0x281   :  { %453 = dma.done.wait [#allocation13], 256  }
 0x282   :  { %454 = vsyncadd [#allocation13], 4294967040 }
 0x283   :  { %246 = vsyncpa [#allocation3], 1 }
 0x284   :  { %247 = vsyncpa [#allocation6], 1 }
 0x285   :  { %248 = vsyncpa [#allocation9], 1 }
 0x286   :  { %249 = vsyncpa [#allocation4], 1 }
 0x287   :  { %250 = vsyncpa [#allocation13], 1 }

// kernel: block_forward.6
= control target key start
LH: loop header
LB: loop body
LE: loop exit
PB: predicated region body
PF: predicated region fallthrough
CT: control target
= control target key end

     0   :  { %s1279_s0 = inlined_call_operand.hbm [shape: bf16[2,3,4,8,8], index: 0, kind: input, shape index: {}, may-alias: {0,1,2}]   ;;  %s1280_s1 = inlined_call_operand.hbm [shape: bf16[2,3,4,8,8], index: 1, kind: input, shape index: {}, may-alias: {0,1,2}]   ;;  %s1281_s2 = inlined_call_operand.hbm [shape: bf16[2,3,4,8,8], index: 2, kind: input, shape index: {}, may-alias: {0,1,2}]   ;;  %s1282_s3 = inlined_call_operand.hbm [shape: bf16[2,4,8,8], index: 3, kind: output, shape index: {}]  }
   0x1   :  { %1294 = sst [smem:[#allocation23_spill]] %s1279_s0 }
   0x2   :  { %1295 = sst [smem:[#allocation24_spill]] %s1280_s1 }
   0x3   :  { %8 = vsyncpa [#allocation7], 0 }
   0x4   :  { %10 = vsyncpa [#allocation7 + $0x1], 0 }
   0x5   :  { %11 = vsyncpa [#allocation10], 0 }
   0x6   :  { %13 = vsyncpa [#allocation10 + $0x1], 0 }
   0x7   :  { %14 = vsyncpa [#allocation8], 0 }
   0x8   :  { %16 = vsyncpa [#allocation8 + $0x1], 0  ;;  %s996_s12 = smov 0   ;;  %s998_s13 = smov 0  }
   0x9   :  { %s1000_s14 = smov 0   ;;  %s1002_s15 = smov 0  }
   0xa   :  { %s1004_s16 = smov 0   ;;  %s1006_s17 = smov 0  }
   0xb   :  { %s1008_s18 = smov 0   ;;  %s1010_s19 = smov 0  }
   0xc LB: > { %1296 = sst [smem:[#allocation16_spill]] %s946_s14  ;;  %s1037_s20 = sadd.s32 4294967295, %s966_s19   ;;  %s966_s19 = sphi %s1010_s19, %s22_s19   ;;  %s962_s18 = sphi %s1008_s18, %s1326_s18   ;;  %s958_s17 = sphi %s1006_s17, %s1325_s17   ;;  %s954_s16 = sphi %s1004_s16, %s1324_s16   ;;  %s950_s15 = sphi %s1002_s15, %s1323_s15   ;;  %s946_s14 = sphi %s1000_s14, %s1322_s14   ;;  %s942_s13 = sphi %s998_s13, %s1328_s13   ;;  %s938_s12 = sphi %s996_s12, %s1327_s12  }
   0xd   : > { %1297 = sst [smem:[#allocation17_spill]] %s958_s17  ;;  %s634_s21 = sadd.s32 4294967294, %s966_s19  }
   0xe   : > { %1298 = sst [smem:[#allocation18_spill]] %s962_s18  ;;  %s44_s22 = sadd.s32 1, %s958_s17 }
   0xf   : > { %s48_s23 = sadd.s32 1, %s962_s18  ;;  %p46_p0 = scmp.ge.s32.totalorder %s44_s22, 4 }
  0x10   : > { %s59_s24 = sadd.s32 1, %s946_s14  ;;  %p66_p1 = scmp.ne.s32.totalorder %s946_s14, %s942_s13 }
  0x11   : > { %p67_p2 = scmp.eq.s32.totalorder %s966_s19, 0  ;;  %s1330_s22 = smov (%p46_p0, %s44_s22), 0 }
  0x12   : > { %1299 = sst [smem:[#allocation19_spill]] %s1330_s22  ;;  %s1332_s23 = smov (!%p46_p0, %s48_s23), %s962_s18 }
  0x13   : > { %s53_s25 = ssub.s32 %s958_s17, %s1330_s22  ;;  %p1051_p3 = por %p67_p2, %p66_p1 }
  0x14   : > { %p50_p4 = scmp.ge.s32.totalorder %s1332_s23, 2  ;;  %p72_p5 = scmp.ne.s32.totalorder %s942_s13, %s938_s12 }
  0x15   : > { %p73_p6 = scmp.eq.s32.totalorder %s1037_s20, 0  ;;  %p160_p7 = scmp.eq.s32.totalorder %s1037_s20, 7 }
  0x16   : > { %s1334_s23 = smov (%p50_p4, %s1332_s23), 0  ;;  %p166_p10 = scmp.eq.s32.totalorder %s634_s21, 7 }
  0x17   : > { %1301 = sst [smem:[#allocation20_spill]] %s1334_s23  ;;  %p1061_p8 = por %p73_p6, %p72_p5 }
  0x18   : > { %p1065_p9 = por %p160_p7, %p66_p1  ;;  %s52_s29 = ssub.s32 %s962_s18, %s1334_s23 }
  0x19   : > { %s1302_s27 = scalar_select %p1061_p8, 1, 0 }
  0x1a   : > { %s1303_s28 = scalar_select %p1065_p9, 1, 0 }
  0x1b   : > { %s54_s30 = sor.u32 %s53_s25, %s52_s29  ;;  %p1071_p12 = por %p166_p10, %p72_p5 }
  0x1c   : > { %p57_p11 = scmp.eq.s32.totalorder %s54_s30, 0  ;;  %p694_p13 = scmp.lt.s32.totalorder %s966_s19, 8 }
  0x1d   : > { %s1304_s4 = scalar_select %p1071_p12, 1, 0 }
  0x1e   : > { %s1283_s5 = sand.u32 1, %s946_s14   ;;  %s671_s8 = smul.u32 12, %s962_s18 }
  0x1f   : > { %1305 = sst [smem:[#allocation21_spill]] %s1304_s4  ;;  %s1082_s7 = sshll.u32 %s1283_s5, 2 }
  0x20   : > { %s1078_s6 = scalar_select %p57_p11, %s946_s14, %s59_s24  }
  0x21   : > { %p1087_p0 = pnand %p694_p13, %p1051_p3  ;;  %s207_s10 = sand.u32 1, %s966_s19  }
  0x22   : > { %1306 = sst [smem:[#allocation22_spill]] %s1078_s6  ;;  %s196_s11 = sadd.s32 %s958_s17, %s671_s8 }
  0x23   : > { %s1307_s9 = scalar_select %p1087_p0, 1, 0 }
  0x24   : > { %s1093_s21 = sshll.u32 %s196_s11, 6  ;;  %s1308_s1 = sld [smem:[#allocation24_spill]] }
  0x25   : > { %s211_s26 = scalar_lea.vmem [#allocation9], %s1082_s7  ;;  %s1105_s23 = scalar_lea.sflag [#allocation10], %s207_s10 }
  0x26   : > { %s222_s5 = sshll.u32 %s211_s26, 4  ;;  %p1110_p3 = pneg %p1087_p0  ;;  %s1102_s5 = int_to_ptr.vmem [resolvable:$true] %s222_s5 }
  0x2a   : > { %s531_s24 = scalar_lea.hbm %s1308_s1, %s1093_s21  ;;  %s777_s26 = scalar_lea.hbm %s1308_s1, 1536 }
  0x2b   : > { %s1099_s30 = scalar_lea.hbm %s531_s24, 256  ;;  %s802_s8 = scalar_lea.hbm %s531_s24, 320 }
  0x2c   : > { %p773_p2 = scmp.ne.s32.totalorder %s1099_s30, %s802_s8  ;;  %p778_p6 = scmp.lt.u32.totalorder %s1099_s30, %s1308_s1 }
  0x2d   : > { %p779_p7 = scmp.lt.u32.totalorder %s777_s26, %s802_s8  ;;  %p781_p11 = scmp.lt.u32.totalorder %s802_s8, %s1099_s30 }
  0x2e   : > { %p775_p4 = pnand %p1110_p3, %p773_p2 }
  0x2f   : > { %p780_p10 = por %p779_p7, %p778_p6 }
  0x30   : > { %p776_p5 = pneg %p775_p4 }
  0x31   : > { %p782_p13 = por %p781_p11, %p780_p10 }
  0x33   : > { %p783_p1 = pnand %p782_p13, %p776_p5 }
  0x35   : > { %786 = shalt.err (!%p783_p1)
}
  0x36   : > { %s787_s10 = scalar_lea.vmem %s1102_s5, 64  ;;  %s968_s24 = smov [#allocation9]  }
  0x37   : > { %p788_p2 = scmp.ne.s32.totalorder %s1102_s5, %s787_s10  ;;  %s792_s25 = sshll.u32 %s968_s24, 4  ;;  %s793_s25 = int_to_ptr.vmem [resolvable:$false] %s792_s25 }
  0x38   : > { %s794_s18 = scalar_lea.vmem %s793_s25, 128  ;;  %p795_p9 = scmp.lt.s32.totalorder %s1102_s5, %s793_s25 }
  0x39   : > { %p790_p4 = pnand %p788_p2, %p1110_p3  ;;  %p796_p8 = scmp.lt.s32.totalorder %s794_s18, %s787_s10 }
  0x3b   : > { %p791_p12 = pneg %p790_p4  ;;  %p797_p6 = por %p796_p8, %p795_p9 }
  0x3d   : > { %p798_p7 = pnand %p797_p6, %p791_p12 }
  0x3f   : > { %801 = shalt.err (!%p798_p7)
}
  0x40   : > { %686 = dma.hbm_to_vmem [thread:$0]  (!%p1087_p0), %s1099_s30, 64, %s1102_s5, %s1105_s23  }
  0x41   : > { %p249_p1 = scmp.lt.s32.totalorder %s966_s19, 9  ;;  %p1310_p5 = scmp.ge.s32.totalorder %s966_s19, 1 }
  0x42   : > { %s1312_s0 = sld [smem:[#allocation23_spill]]  ;;  %s190_s10 = scalar_lea.vmem [#allocation6], %s1082_s7 }
  0x43   : > { %p1137_p10 = pnand %p1310_p5, %p249_p1  ;;  %s200_s24 = sshll.u32 %s190_s10, 4  ;;  %s201_s24 = int_to_ptr.vmem [resolvable:$true] %s200_s24 }
  0x44   : > { %s1313_s25 = sand.u32 1, %s946_s14  }
  0x45   : > { %s1311_s22 = scalar_select %p1137_p10, 1, 0 }
  0x46   : > { %s187_s5 = scalar_lea.sflag [#allocation7], %s1313_s25 }
  0x48   : > { %s1145_s26 = scalar_lea.hbm %s1312_s0, %s1093_s21  ;;  %s808_s8 = scalar_lea.hbm %s1312_s0, 1536 }
  0x49   : > { %s803_s30 = scalar_lea.hbm %s1145_s26, 64  ;;  %p809_p11 = scmp.lt.u32.totalorder %s1145_s26, %s1312_s0 }
  0x4a   : > { %p804_p8 = scmp.ne.s32.totalorder %s1145_s26, %s803_s30  ;;  %p810_p13 = scmp.lt.u32.totalorder %s808_s8, %s803_s30 }
  0x4b   : > { %p812_p4 = scmp.lt.u32.totalorder %s803_s30, %s1145_s26 }
  0x4c   : > { %p806_p9 = pnand %p804_p8, %p1110_p3  ;;  %p811_p2 = por %p810_p13, %p809_p11 }
  0x4e   : > { %p807_p12 = pneg %p806_p9  ;;  %p813_p6 = por %p812_p4, %p811_p2 }
  0x50   : > { %p814_p7 = pnand %p813_p6, %p807_p12 }
  0x52   : > { %817 = shalt.err (!%p814_p7)
}
  0x53   : > { %s818_s10 = scalar_lea.vmem %s201_s24, 64  ;;  %s969_s25 = smov [#allocation6]  }
  0x54   : > { %p819_p1 = scmp.ne.s32.totalorder %s201_s24, %s818_s10  ;;  %s823_s6 = sshll.u32 %s969_s25, 4  ;;  %s824_s6 = int_to_ptr.vmem [resolvable:$false] %s823_s6 }
  0x55   : > { %s825_s1 = scalar_lea.vmem %s824_s6, 128  ;;  %p826_p9 = scmp.lt.s32.totalorder %s201_s24, %s824_s6 }
  0x56   : > { %p821_p5 = pnand %p819_p1, %p1110_p3  ;;  %p827_p10 = scmp.lt.s32.totalorder %s825_s1, %s818_s10 }
  0x58   : > { %p822_p8 = pneg %p821_p5  ;;  %p828_p0 = por %p827_p10, %p826_p9 }
  0x5a   : > { %p829_p11 = pnand %p828_p0, %p822_p8 }
  0x5c   : > { %832 = shalt.err (!%p829_p11)
}
  0x5d   : > { %p1314_p13 = scmp.ne.s32.totalorder %s1307_s9, 0  ;;  %s540_s18 = scalar_lea.hbm %s1281_s2, %s1093_s21 }
  0x5e   : > { %s233_s8 = scalar_lea.vmem [#allocation11], %s1082_s7  ;;  %s541_s25 = scalar_lea.hbm %s540_s18, 512 }
  0x5f   : > { %683 = dma.hbm_to_vmem [thread:$0]  (!%p1314_p13), %s1145_s26, 64, %s201_s24, %s187_s5  }
  0x60   : > { %s244_s29 = sshll.u32 %s233_s8, 4  ;;  %s863_s6 = scalar_lea.hbm %s540_s18, 576  ;;  %s245_s29 = int_to_ptr.vmem [resolvable:$true] %s244_s29 }
  0x61   : > { %p834_p12 = scmp.ne.s32.totalorder %s541_s25, %s863_s6  ;;  %s838_s0 = scalar_lea.hbm %s1281_s2, 1536 }
  0x62   : > { %p839_p2 = scmp.lt.u32.totalorder %s541_s25, %s1281_s2  ;;  %p840_p4 = scmp.lt.u32.totalorder %s838_s0, %s863_s6 }
  0x63   : > { %p836_p0 = pnand %p834_p12, %p1110_p3  ;;  %p842_p7 = scmp.lt.u32.totalorder %s863_s6, %s541_s25 }
  0x64   : > { %p841_p6 = por %p840_p4, %p839_p2 }
  0x65   : > { %p837_p10 = pneg %p836_p0 }
  0x66   : > { %p843_p1 = por %p842_p7, %p841_p6 }
  0x68   : > { %p844_p5 = pnand %p843_p1, %p837_p10 }
  0x6a   : > { %847 = shalt.err (!%p844_p5)
}
  0x6b   : > { %s848_s7 = scalar_lea.vmem %s245_s29, 64  ;;  %s970_s21 = smov [#allocation11]  }
  0x6c   : > { %p849_p8 = scmp.ne.s32.totalorder %s245_s29, %s848_s7  ;;  %s853_s26 = sshll.u32 %s970_s21, 4  ;;  %s854_s26 = int_to_ptr.vmem [resolvable:$false] %s853_s26 }
  0x6d   : > { %s855_s24 = scalar_lea.vmem %s854_s26, 128  ;;  %p856_p12 = scmp.lt.s32.totalorder %s245_s29, %s854_s26 }
  0x6e   : > { %p851_p9 = pnand %p849_p8, %p1110_p3  ;;  %p857_p0 = scmp.lt.s32.totalorder %s855_s24, %s848_s7 }
  0x70   : > { %p852_p11 = pneg %p851_p9  ;;  %p858_p13 = por %p857_p0, %p856_p12 }
  0x72   : > { %p859_p2 = pnand %p858_p13, %p852_p11 }
  0x74   : > { %862 = shalt.err (!%p859_p2)
}
  0x75   : > { %p1315_p4 = scmp.ne.s32.totalorder %s1307_s9, 0  ;;  %p1316_p10 = scmp.ne.s32.totalorder %s1311_s22, 0 }
  0x76   : > { %s1188_s0 = sand.u32 (!%p1316_p10), 1, %s942_s13   ;;  %p1317_p3 = scmp.ne.s32.totalorder (!%p1316_p10), %s1302_s27, 0 }
  0x77   : > { %689 = dma.hbm_to_vmem [thread:$0]  (!%p1315_p4), %s541_s25, 64, %s245_s29, %s1105_s23  }
  0x78   : > { %253 = sbr.rel (%p1316_p10) target bundleno = 953 (0x3b9), region = 32  ;;  %s1191_s14 = sshll.u32 (!%p1316_p10), %s1188_s0, 2 }
  0x79   : > { %s256_s4 = scalar_lea.sflag (!%p1316_p10), [#allocation7], %s1188_s0  ;;  %s259_s11 = scalar_lea.vmem (!%p1316_p10), [#allocation6], %s1191_s14 }
  0x7f   : > { %925 = dma.done.wait (%p1317_p3), %s256_s4, 64  }
  0x80   : > { %927 = vsyncadd (%p1317_p3), %s256_s4, 4294967232  ;;  %s264_s23 = sand.u32 1, %s1037_s20   ;;  %s268_s22 = scalar_lea.vmem [#allocation9], %s1191_s14 }
  0x81   : > { %s265_s9 = scalar_lea.sflag [#allocation10], %s264_s23 }
  0x82   : > { %929 = dma.done.wait (%p1317_p3), %s265_s9, 128  }
  0x83   : > { %931 = vsyncadd (%p1317_p3), %s265_s9, 4294967168  ;;  %vm323_vm0 = vcmask 64512   ;;  %v971_v0 = vmov 0.0   ;;  %vm972_vm1 = vmmov 0   ;;  %v325_v1 = vld [vmem:[%s268_s22] sm:$0xf] }
  0x84   : > { %659 = vmatprep.subr.bf16.mxu0 %v971_v0  ;;  %324 = vst.msk [vmem:[#allocation5] sm:$0xff] %vm323_vm0, %v971_v0  ;;  %661 = vmatprep.mubr.msk.bf16.mxu0 %vm972_vm1, %v971_v0  ;;  %v316_v2 = vld [vmem:[%s259_s11] sm:$0xf]  ;;  %vm318_vm2 = vcmask 60416   ;;  %v333_v3 = vsel %vm323_vm0, %v325_v1, 0  ;;  %vm320_vm3 = vcmask 7168  }
  0x85   : > { %665 = vmatprep.subr.bf16.mxu1 %v971_v0  ;;  %667 = vmatprep.mubr.msk.bf16.mxu1 %vm972_vm1, %v971_v0  ;;  %v317_v4 = vmul.bf16 1052065461, %v316_v2  ;;  %v973_v6 = vmov -inf   ;;  %322 = vst.msk [vmem:[#allocation4] sm:$0xff] %vm320_vm3, %v971_v0  ;;  %v974_v12 = vmov 0   ;;  %vm410_vm4 = vcmask 1043456  }
  0x86   : > { %660 = vmatpush3.bf16.xpose.msra.mxu0 %v333_v3  ;;  %321 = vst.msk [vmem:[#allocation3] sm:$0xff] %vm320_vm3, %v973_v6  ;;  %764 = vset.pattern.permute.xlu0 %v974_v12  ;;  %s277_s20 = scalar_lea.vmem [#allocation11], %s1191_s14  ;;  %s651_s27 = sshll.u32 %s954_s16, 2 }
  0x87   : > { %319 = vst.msk [vmem:[#allocation2] sm:$0xf] %vm318_vm2, %v317_v4  ;;  %765 = vset.pattern.permute.xlu1 %v974_v12  ;;  %v326_v17 = vld [vmem:[%s277_s20] sm:$0xf]  ;;  %s485_s5 = sadd.s32 %s950_s15, %s651_s27  ;;  %s309_s30 = scalar_lea.vmem [#allocation12], %s1191_s14 }
  0x88   : > { %v412_v18 = vsel %vm410_vm4, %v326_v17, 0  ;;  %s652_s17 = sshll.u32 %s485_s5, 6  ;;  %s489_s18 = sshll.u32 %s309_s30, 4  ;;  %s1226_s18 = int_to_ptr.vmem [resolvable:$true] %s489_s18 }
  0x89   : > { %666 = vmatpush3.bf16.msra.mxu1 %v412_v18  ;;  %s1224_s25 = scalar_lea.hbm %s1282_s3, %s652_s17  ;;  %s473_s15 = scalar_lea.sflag [#allocation8], %s1188_s0 }
  0x8a   : > { %s864_s16 = scalar_lea.vmem %s1226_s18, 64  ;;  %p1318_p6 = scmp.ne.s32.totalorder %s1303_s28, 0 }
  0x8b   : > { %v399_v33 = vld [vmem:[#allocation5] sm:$0xff]  ;;  %p865_p13 = scmp.ne.s32.totalorder %s1226_s18, %s864_s16  ;;  %s975_s6 = smov [#allocation12]  }
  0x8c   : > { %v391_v27 = vld [vmem:[#allocation4] sm:$0xff]  ;;  %s868_s10 = sshll.u32 %s975_s6, 4  ;;  %s869_s10 = int_to_ptr.vmem [resolvable:$false] %s868_s10 }
  0x8d   : > { %v375_v13 = vld [vmem:[#allocation3] sm:$0xff]  ;;  %p866_p7 = pnand %p865_p13, %p1318_p6  ;;  %s870_s1 = scalar_lea.vmem %s869_s10, 128 }
  0x8e   : > { %v327_v5 = vld [vmem:[#allocation2] sm:$0xf]  ;;  %p871_p5 = scmp.lt.s32.totalorder %s1226_s18, %s869_s10  ;;  %p872_p8 = scmp.lt.s32.totalorder %s870_s1, %s864_s16 }
  0x8f   : > { %662 = vmatmul.mubr.msk.bf16.vlgmr.msra.gmra.mrb[0].mxu0 %vm323_vm0, %v327_v5  ;;  %p867_p1 = pneg %p866_p7 }
  0x90   : > { %p873_p9 = por %p872_p8, %p871_p5 }
  0x92   : > { %p874_p11 = pnand %p873_p9, %p867_p1 }
 0x162   : > { %v369_v7 = vpop.f32.mrb[0].mxu0 }
 0x163   : > { %v663_v8 = vpop.f32.mrb[1].mxu0  ;;  %v376_v9 = vsel %vm323_vm0, %v369_v7, -inf }
 0x164   : > { %377 = vmax.xlane.f32.xlu0 %v376_v9  ;;  %v372_v10 = vpop.f32.mrb[2].mxu0 }
 0x165   : > { %v664_v11 = vpop.f32.mrb[3].mxu0 }
 0x1f1   : > { %v378_v14 = vpop.xlane.xlu0 %377 }
 0x1f2   : > { %v379_v15 = vmax.f32 %v375_v13, %v378_v14 }
 0x1f4   : > { %v380_v16 = vsub.f32 %v375_v13, %v379_v15  ;;  %456 = vst.msk [vmem:[#allocation3] sm:$0xff] %vm320_vm3, %v379_v15  ;;  %385 = vperm.xlu0 %764, %v379_v15  }
 0x1f6   : > { %v381_v25 = vmul.f32 1.442695, %v380_v16 }
 0x273   : > { %v386_v19 = vpop.permute.xlu0 %385 }
 0x274   : > { %v388_v20 = vsub.f32 %v369_v7, %v386_v19 }
 0x276   : > { %v389_v21 = vmul.f32 1.442695, %v388_v20 }
 0x278   : > { %766 = vpow2.f32 %v389_v21 }
 0x279   : > { %768 = vpow2.f32 %v381_v25 }
 0x282   : > { %v767_v22 = vpop.eup %766 }
 0x283   : > { %v393_v23 = vsel %vm323_vm0, %v767_v22, 0.0  ;;  %v406_v24 = vpack.c.bf16 %v767_v22, %v767_v22  ;;  %v769_v26 = vpop.eup %768 }
 0x284   : > { %394 = vadd.xlane.f32.xlu1 %v393_v23  ;;  %v392_v28 = vmul.f32 %v769_v26, %v391_v27 }
 0x285   : > { %668 = vmatmul.mubr.msk.bf16.vlgmr.msra.gmra.mrb[0].mxu1 %vm323_vm0, %v406_v24 }
 0x295   : > { %402 = vperm.xlu1 %765, %v769_v26  }
 0x311   : > { %v395_v29 = vpop.xlane.xlu1 %394 }
 0x312   : > { %v396_v30 = vadd.f32 %v395_v29, %v392_v28 }
 0x314   : > { %398 = vst.msk [vmem:[#allocation4] sm:$0xff] %vm320_vm3, %v396_v30 }
 0x315   : > { %v403_v34 = vpop.permute.xlu1 %402 }
 0x316   : > { %v405_v35 = vmul.f32 %v403_v34, %v399_v33 }
 0x31b   : > { %v460_v31 = vld [vmem:[#allocation4] sm:$0xff] }
 0x31c   : > { %770 = vrcp.f32 %v460_v31 }
 0x326   : > { %v771_v32 = vpop.eup %770 }
 0x327   : > { %465 = vperm.xlu1 %765, %v771_v32  }
 0x358   : > { %v448_v36 = vpop.f32.mrb[0].mxu1 }
 0x359   : > { %v454_v37 = vadd.f32 %v448_v36, %v405_v35  ;;  %v669_v38 = vpop.f32.mrb[1].mxu1 }
 0x35a   : > { %v451_v39 = vpop.f32.mrb[2].mxu1 }
 0x35b   : > { %455 = vst.msk [vmem:[#allocation5] sm:$0xff] %vm323_vm0, %v454_v37  ;;  %v670_v40 = vpop.f32.mrb[3].mxu1 }
 0x362   : > { %v462_v41 = vld [vmem:[#allocation5] sm:$0xff] }
 0x3a6   : > { %v466_v42 = vpop.permute.xlu1 %465 }
 0x3a7   : > { %v468_v43 = vmul.f32 %v466_v42, %v462_v41 }
 0x3a9   : > { %v469_v44 = vpack.c.bf16 %v468_v43, %v468_v43 }
 0x3ab   : > { %471 = vst.msk [vmem:[%s309_s30] sm:$0xf] %vm318_vm2, %v469_v44 }
 0x3ac   : > { %877 = shalt.err (!%p874_p11)
}
 0x3ad   : > { %s878_s7 = scalar_lea.hbm %s1224_s25, 64  ;;  %s882_s24 = scalar_lea.hbm %s1282_s3, 512 }
 0x3ae   : > { %p879_p12 = scmp.ne.s32.totalorder %s1224_s25, %s878_s7  ;;  %p883_p4 = scmp.lt.u32.totalorder %s1224_s25, %s1282_s3 }
 0x3af   : > { %p884_p10 = scmp.lt.u32.totalorder %s882_s24, %s878_s7  ;;  %p886_p13 = scmp.lt.u32.totalorder %s878_s7, %s1224_s25 }
 0x3b0   : > { %p880_p0 = pnand %p879_p12, %p1318_p6 }
 0x3b1   : > { %p885_p3 = por %p884_p10, %p883_p4 }
 0x3b2   : > { %p881_p2 = pneg %p880_p0 }
 0x3b3   : > { %p887_p7 = por %p886_p13, %p885_p3 }
 0x3b5   : > { %p888_p1 = pnand %p887_p7, %p881_p2 }
 0x3b7   : > { %891 = shalt.err (!%p888_p1)
}
 0x3b8   : > { %678 = dma.vmem_to_hbm [thread:$0]  (%p1318_p6), %s1226_s18, 64, %s1224_s25, %s473_s15  }
 0x3b9 PF: > { %s1319_s4 = sld [smem:[#allocation21_spill]]  ;;  %p695_p5 = scmp.ge.s32.totalorder %s966_s19, 2 }
 0x3ba   : > { %s501_s11 = sand.u32 1, %s938_s12  }
 0x3bb   : > { %s502_s23 = scalar_lea.sflag [#allocation8], %s501_s11 }
 0x3bf   : > { %p1320_p8 = scmp.ne.s32.totalorder %s1319_s4, 0 }
 0x3c1   : > { %p691_p9 = pnand %p695_p5, %p1320_p8 }
 0x3c3   : > { %933 = dma.done.wait (!%p691_p9), %s502_s23, 64  }
 0x3c4   : > { %935 = vsyncadd (!%p691_p9), %s502_s23, 4294967232  ;;  %s22_s19 = sadd.s32 1, %s966_s19   ;;  %s1321_s9 = sld [smem:[#allocation16_spill]] }
 0x3c5   : > { %p19_p11 = scmp.ge.s32.totalorder %s22_s19, 10   ;;  %s1322_s14 = sld [smem:[#allocation22_spill]] }
 0x3c6   : > { %s1323_s15 = sld [smem:[#allocation17_spill]]  ;;  %s1324_s16 = sld [smem:[#allocation18_spill]] }
 0x3c7   : > { %s1325_s17 = sld [smem:[#allocation19_spill]]  ;;  %s1326_s18 = sld [smem:[#allocation20_spill]] }
 0x3c8   : > { %s1327_s12 = smov %s942_s13  ;;  %21 = sbr.rel (!%p19_p11) target bundleno = 12 (0xc), region = 109 }
 0x3ca   : > { %s1328_s13 = smov %s1321_s9 }
 0x3cf   :  { %507 = vsyncpa [#allocation7], 1 }
 0x3d0   :  { %509 = vsyncpa [#allocation7 + $0x1], 1 }
 0x3d1   :  { %510 = vsyncpa [#allocation10], 1 }
 0x3d2   :  { %512 = vsyncpa [#allocation10 + $0x1], 1 }
 0x3d3   :  { %513 = vsyncpa [#allocation8], 1 }
 0x3d4   :  { %515 = vsyncpa [#allocation8 + $0x1], 1 }

// kernel: block_forward.9
= control target key start
LH: loop header
LB: loop body
LE: loop exit
PB: predicated region body
PF: predicated region fallthrough
CT: control target
= control target key end

     0   :  { %s1777_s0 = inlined_call_operand.hbm [shape: bf16[4,8,32], index: 0, kind: input, shape index: {}]   ;;  %s1778_s1 = inlined_call_operand.hbm [shape: bf16[4,32,128], index: 1, kind: input, shape index: {}]   ;;  %s1779_s2 = inlined_call_operand.hbm [shape: f32[4,1,128], index: 2, kind: input, shape index: {}]   ;;  %s1780_s3 = inlined_call_operand.hbm [shape: bf16[4,128,32], index: 3, kind: input, shape index: {}]   ;;  %s1781_s4 = inlined_call_operand.hbm [shape: f32[4,1,32], index: 4, kind: input, shape index: {}]   ;;  %s1782_s5 = inlined_call_operand.hbm [shape: f32[4,8,1], index: 5, kind: input, shape index: {}]   ;;  %s1783_s6 = inlined_call_operand.hbm [shape: bf16[4,8,32], index: 6, kind: output, shape index: {}]  }
   0x1   :  { %1794 = sst [smem:[#allocation25_spill]] %s1777_s0 }
   0x2   :  { %1795 = sst [smem:[#allocation26_spill]] %s1778_s1 }
   0x3   :  { %1796 = sst [smem:[#allocation27_spill]] %s1780_s3 }
   0x4   :  { %11 = vsyncpa [#allocation4], 0 }
   0x5   :  { %13 = vsyncpa [#allocation4 + $0x1], 0 }
   0x6   :  { %14 = vsyncpa [#allocation7], 0 }
   0x7   :  { %16 = vsyncpa [#allocation7 + $0x1], 0 }
   0x8   :  { %17 = vsyncpa [#allocation10], 0 }
   0x9   :  { %19 = vsyncpa [#allocation10 + $0x1], 0 }
   0xa   :  { %20 = vsyncpa [#allocation13], 0 }
   0xb   :  { %22 = vsyncpa [#allocation13 + $0x1], 0 }
   0xc   :  { %23 = vsyncpa [#allocation5], 0 }
   0xd   :  { %25 = vsyncpa [#allocation5 + $0x1], 0  ;;  %s1405_s21 = smov 0   ;;  %s1407_s22 = smov 0  }
   0xe   :  { %s1409_s23 = smov 0   ;;  %s1411_s24 = smov 0  }
   0xf   :  { %s1413_s25 = smov 0   ;;  %s1415_s26 = smov 0  }
  0x10 LB: > { %1797 = sst [smem:[#allocation20_spill]] %s1336_s21  ;;  %s1436_s27 = sadd.s32 4294967295, %s1356_s26   ;;  %s1356_s26 = sphi %s1415_s26, %s31_s26   ;;  %s1352_s25 = sphi %s1413_s25, %s1830_s25   ;;  %s1348_s24 = sphi %s1411_s24, %s1829_s24   ;;  %s1344_s23 = sphi %s1409_s23, %s1825_s23   ;;  %s1340_s22 = sphi %s1407_s22, %s1828_s22   ;;  %s1336_s21 = sphi %s1405_s21, %s1827_s21  }
  0x11   : > { %1798 = sst [smem:[#allocation21_spill]] %s1344_s23  ;;  %s899_s28 = sadd.s32 4294967294, %s1356_s26  }
  0x12   : > { %s50_s29 = sadd.s32 1, %s1352_s25  ;;  %s59_s30 = sadd.s32 1, %s1344_s23 }
  0x13   : > { %p52_p0 = scmp.ge.s32.totalorder %s50_s29, 4  ;;  %p66_p1 = scmp.ne.s32.totalorder %s1344_s23, %s1340_s22 }
  0x14   : > { %p67_p2 = scmp.eq.s32.totalorder %s1356_s26, 0  ;;  %p72_p3 = scmp.ne.s32.totalorder %s1340_s22, %s1336_s21 }
  0x15   : > { %s1832_s29 = smov (%p52_p0, %s50_s29), 0  ;;  %p73_p5 = scmp.eq.s32.totalorder %s1436_s27, 0 }
  0x16   : > { %1799 = sst [smem:[#allocation22_spill]] %s1832_s29  ;;  %p1448_p4 = por %p67_p2, %p66_p1 }
  0x17   : > { %s54_s8 = ssub.s32 %s1352_s25, %s1832_s29  ;;  %p236_p6 = scmp.eq.s32.totalorder %s1436_s27, 3 }
  0x18   : > { %p57_p7 = scmp.eq.s32.totalorder %s54_s8, 0  ;;  %p1456_p8 = por %p73_p5, %p72_p3 }
  0x19   : > { %p1460_p9 = por %p236_p6, %p66_p1  ;;  %p242_p10 = scmp.eq.s32.totalorder %s899_s28, 3 }
  0x1a   : > { %s1801_s9 = scalar_select %p1456_p8, 1, 0 }
  0x1b   : > { %s1802_s10 = scalar_select %p1460_p9, 1, 0 }
  0x1c   : > { %s1465_s11 = scalar_select %p57_p7, %s1344_s23, %s59_s30  }
  0x1d   : > { %p1467_p11 = por %p242_p10, %p72_p3  ;;  %p1016_p12 = scmp.lt.s32.totalorder %s1356_s26, 4 }
  0x1e   : > { %1803 = sst [smem:[#allocation23_spill]] %s1465_s11  ;;  %s1473_s13 = sand.u32 1, %s1344_s23  }
  0x1f   : > { %s1804_s12 = scalar_select %p1467_p11, 1, 0 }
  0x20   : > { %s1785_s14 = sand.u32 1, %s1356_s26   ;;  %s904_s15 = sshll.u32 %s1473_s13, 4 }
  0x21   : > { %1805 = sst [smem:[#allocation24_spill]] %s1804_s12  ;;  %p1479_p13 = pnand %p1016_p12, %p1448_p4 }
  0x22   : > { %s937_s17 = sshll.u32 %s1352_s25, 8  ;;  %s1807_s1 = sld [smem:[#allocation26_spill]] }
  0x23   : > { %s1806_s16 = scalar_select %p1479_p13, 1, 0 }
  0x24   : > { %s285_s28 = scalar_lea.vmem [#allocation6], %s904_s15  ;;  %s1493_s7 = scalar_lea.sflag [#allocation7], %s1785_s14 }
  0x25   : > { %s293_s30 = sshll.u32 %s285_s28, 4  ;;  %p1499_p1 = pneg %p1479_p13  ;;  %s1489_s30 = int_to_ptr.vmem [resolvable:$true] %s293_s30 }
  0x28   : > { %s1487_s20 = scalar_lea.hbm %s1807_s1, %s937_s17  ;;  %s1087_s15 = scalar_lea.hbm %s1807_s1, 1024 }
  0x29   : > { %s1082_s8 = scalar_lea.hbm %s1487_s20, 256  ;;  %p1088_p4 = scmp.lt.u32.totalorder %s1487_s20, %s1807_s1 }
  0x2a   : > { %p1083_p0 = scmp.ne.s32.totalorder %s1487_s20, %s1082_s8  ;;  %p1089_p5 = scmp.lt.u32.totalorder %s1087_s15, %s1082_s8 }
  0x2b   : > { %p1091_p7 = scmp.lt.u32.totalorder %s1082_s8, %s1487_s20 }
  0x2c   : > { %p1085_p2 = pnand %p1499_p1, %p1083_p0  ;;  %p1090_p6 = por %p1089_p5, %p1088_p4 }
  0x2e   : > { %p1086_p3 = pneg %p1085_p2  ;;  %p1092_p10 = por %p1091_p7, %p1090_p6 }
  0x30   : > { %p1093_p12 = pnand %p1092_p10, %p1086_p3 }
  0x32   : > { %1096 = shalt.err (!%p1093_p12)
}
  0x33   : > { %s1097_s14 = scalar_lea.vmem %s1489_s30, 256  ;;  %s1358_s17 = smov [#allocation6]  }
  0x34   : > { %p1098_p0 = scmp.ne.s32.totalorder %s1489_s30, %s1097_s14  ;;  %s1102_s18 = sshll.u32 %s1358_s17, 4  ;;  %s1103_s18 = int_to_ptr.vmem [resolvable:$false] %s1102_s18 }
  0x35   : > { %s1104_s19 = scalar_lea.vmem %s1103_s18, 512  ;;  %p1105_p9 = scmp.lt.s32.totalorder %s1489_s30, %s1103_s18 }
  0x36   : > { %p1100_p2 = pnand %p1098_p0, %p1499_p1  ;;  %p1106_p8 = scmp.lt.s32.totalorder %s1104_s19, %s1097_s14 }
  0x38   : > { %p1101_p11 = pneg %p1100_p2  ;;  %p1107_p4 = por %p1106_p8, %p1105_p9 }
  0x3a   : > { %p1108_p5 = pnand %p1107_p4, %p1101_p11 }
  0x3c   : > { %1111 = shalt.err (!%p1108_p5)
}
  0x3d   : > { %s1789_s8 = smov 64   ;;  %s1360_s15 = smov 4  }
  0x3e   : > { %999 = dma.hbm_to_vmem [thread:$0]  (!%p1479_p13), %s1487_s20, 256, %s1489_s30, %s1493_s7, %s1789_s8, %s1789_s8, %s1360_s15  }
  0x3f   : > { %p914_p8 = scmp.ge.s32.totalorder %s1356_s26, 1  ;;  %p378_p9 = scmp.lt.s32.totalorder %s1356_s26, 5 }
  0x40   : > { %s908_s14 = sshll.u32 %s1473_s13, 6  ;;  %s938_s17 = sshll.u32 %s1352_s25, 10 }
  0x41   : > { %p1529_p11 = pnand %p914_p8, %p378_p9  ;;  %s325_s18 = scalar_lea.vmem [#allocation9], %s908_s14 }
  0x42   : > { %s334_s19 = sshll.u32 %s325_s18, 4  ;;  %s1810_s3 = sld [smem:[#allocation27_spill]]  ;;  %s1539_s19 = int_to_ptr.vmem [resolvable:$true] %s334_s19 }
  0x43   : > { %s1809_s28 = scalar_select %p1529_p11, 1, 0 }
  0x44   : > { %s1811_s20 = sand.u32 1, %s1356_s26  }
  0x45   : > { %s1543_s30 = scalar_lea.sflag [#allocation10], %s1811_s20 }
  0x48   : > { %s1537_s23 = scalar_lea.hbm %s1810_s3, %s938_s17  ;;  %s1117_s1 = scalar_lea.hbm %s1810_s3, 4096 }
  0x49   : > { %s1112_s8 = scalar_lea.hbm %s1537_s23, 1024  ;;  %p1118_p10 = scmp.lt.u32.totalorder %s1537_s23, %s1810_s3 }
  0x4a   : > { %p1113_p3 = scmp.ne.s32.totalorder %s1537_s23, %s1112_s8  ;;  %p1119_p12 = scmp.lt.u32.totalorder %s1117_s1, %s1112_s8 }
  0x4b   : > { %p1121_p2 = scmp.lt.u32.totalorder %s1112_s8, %s1537_s23 }
  0x4c   : > { %p1115_p6 = pnand %p1113_p3, %p1499_p1  ;;  %p1120_p0 = por %p1119_p12, %p1118_p10 }
  0x4e   : > { %p1116_p7 = pneg %p1115_p6  ;;  %p1122_p4 = por %p1121_p2, %p1120_p0 }
  0x50   : > { %p1123_p5 = pnand %p1122_p4, %p1116_p7 }
  0x52   : > { %1126 = shalt.err (!%p1123_p5)
}
  0x53   : > { %s1127_s20 = scalar_lea.vmem %s1539_s19, 1024  ;;  %s1361_s14 = smov [#allocation9]  }
  0x54   : > { %p1128_p8 = scmp.ne.s32.totalorder %s1539_s19, %s1127_s20  ;;  %s1132_s18 = sshll.u32 %s1361_s14, 4  ;;  %s1133_s18 = int_to_ptr.vmem [resolvable:$false] %s1132_s18 }
  0x55   : > { %s1134_s11 = scalar_lea.vmem %s1133_s18, 2048  ;;  %p1135_p6 = scmp.lt.s32.totalorder %s1539_s19, %s1133_s18 }
  0x56   : > { %p1130_p9 = pnand %p1128_p8, %p1499_p1  ;;  %p1136_p11 = scmp.lt.s32.totalorder %s1134_s11, %s1127_s20 }
  0x58   : > { %p1131_p3 = pneg %p1130_p9  ;;  %p1137_p10 = por %p1136_p11, %p1135_p6 }
  0x5a   : > { %p1138_p12 = pnand %p1137_p10, %p1131_p3 }
  0x5c   : > { %1141 = shalt.err (!%p1138_p12)
}
  0x5d   : > { %s1812_s8 = smov 64   ;;  %s902_s1 = sshll.u32 %s1473_s13, 2 }
  0x5e   : > { %1005 = dma.hbm_to_vmem [thread:$0]  (!%p1479_p13), %s1537_s23, 1024, %s1539_s19, %s1543_s30, %s1812_s8, %s1812_s8, %s1360_s15  }
  0x5f   : > { %s903_s17 = sshll.u32 %s1352_s25, 6  ;;  %s1813_s0 = sld [smem:[#allocation25_spill]] }
  0x60   : > { %s266_s11 = scalar_lea.vmem [#allocation3], %s902_s1  ;;  %s263_s12 = scalar_lea.sflag [#allocation4], %s1473_s13 }
  0x61   : > { %s274_s3 = sshll.u32 %s266_s11, 4  ;;  %s275_s3 = int_to_ptr.vmem [resolvable:$true] %s274_s3 }
  0x65   : > { %s1575_s18 = scalar_lea.hbm %s1813_s0, %s903_s17  ;;  %s1147_s19 = scalar_lea.hbm %s1813_s0, 256 }
  0x66   : > { %s1142_s21 = scalar_lea.hbm %s1575_s18, 64  ;;  %p1148_p2 = scmp.lt.u32.totalorder %s1575_s18, %s1813_s0 }
  0x67   : > { %p1143_p11 = scmp.ne.s32.totalorder %s1575_s18, %s1142_s21  ;;  %p1149_p4 = scmp.lt.u32.totalorder %s1147_s19, %s1142_s21 }
  0x68   : > { %p1151_p8 = scmp.lt.u32.totalorder %s1142_s21, %s1575_s18 }
  0x69   : > { %p1145_p7 = pnand %p1143_p11, %p1499_p1  ;;  %p1150_p5 = por %p1149_p4, %p1148_p2 }
  0x6b   : > { %p1146_p0 = pneg %p1145_p7  ;;  %p1152_p9 = por %p1151_p8, %p1150_p5 }
  0x6d   : > { %p1153_p3 = pnand %p1152_p9, %p1146_p0 }
  0x6f   : > { %1156 = shalt.err (!%p1153_p3)
}
  0x70   : > { %s1157_s1 = scalar_lea.vmem %s275_s3, 64  ;;  %s1362_s14 = smov [#allocation3]  }
  0x71   : > { %p1158_p6 = scmp.ne.s32.totalorder %s275_s3, %s1157_s1  ;;  %s1162_s20 = sshll.u32 %s1362_s14, 4  ;;  %s1163_s20 = int_to_ptr.vmem [resolvable:$false] %s1162_s20 }
  0x72   : > { %s1164_s11 = scalar_lea.vmem %s1163_s20, 128  ;;  %p1165_p11 = scmp.lt.s32.totalorder %s275_s3, %s1163_s20 }
  0x73   : > { %p1160_p10 = pnand %p1158_p6, %p1499_p1  ;;  %p1166_p7 = scmp.lt.s32.totalorder %s1164_s11, %s1157_s1 }
  0x75   : > { %p1161_p12 = pneg %p1160_p10  ;;  %p1167_p13 = por %p1166_p7, %p1165_p11 }
  0x77   : > { %p1168_p2 = pnand %p1167_p13, %p1161_p12 }
  0x79   : > { %1171 = shalt.err (!%p1168_p2)
}
  0x7a   : > { %p1814_p4 = scmp.ne.s32.totalorder %s1806_s16, 0  ;;  %s907_s21 = sshll.u32 %s1352_s25, 4 }
  0x7b   : > { %s306_s23 = scalar_lea.vmem [#allocation8], %s1473_s13  ;;  %s312_s17 = scalar_lea.hbm %s1779_s2, %s907_s21 }
  0x7c   : > { %996 = dma.hbm_to_vmem [thread:$0]  (!%p1814_p4), %s1575_s18, 64, %s275_s3, %s263_s12  }
  0x7d   : > { %s314_s15 = sshll.u32 %s306_s23, 4  ;;  %s1172_s1 = scalar_lea.hbm %s312_s17, 16  ;;  %s315_s15 = int_to_ptr.vmem [resolvable:$true] %s314_s15 }
  0x7e   : > { %p1173_p13 = scmp.ne.s32.totalorder %s312_s17, %s1172_s1  ;;  %s1177_s11 = scalar_lea.hbm %s1779_s2, 64 }
  0x7f   : > { %p1178_p8 = scmp.lt.u32.totalorder %s312_s17, %s1779_s2  ;;  %p1179_p9 = scmp.lt.u32.totalorder %s1177_s11, %s1172_s1 }
  0x80   : > { %p1175_p0 = pnand %p1173_p13, %p1499_p1  ;;  %p1181_p6 = scmp.lt.u32.totalorder %s1172_s1, %s312_s17 }
  0x81   : > { %p1180_p3 = por %p1179_p9, %p1178_p8 }
  0x82   : > { %p1176_p5 = pneg %p1175_p0 }
  0x83   : > { %p1182_p10 = por %p1181_p6, %p1180_p3 }
  0x85   : > { %p1183_p12 = pnand %p1182_p10, %p1176_p5 }
  0x87   : > { %1186 = shalt.err (!%p1183_p12)
}
  0x88   : > { %s1187_s12 = scalar_lea.vmem %s315_s15, 16  ;;  %s1363_s18 = smov [#allocation8]  }
  0x89   : > { %p1188_p11 = scmp.ne.s32.totalorder %s315_s15, %s1187_s12  ;;  %s1192_s23 = sshll.u32 %s1363_s18, 4  ;;  %s1193_s23 = int_to_ptr.vmem [resolvable:$false] %s1192_s23 }
  0x8a   : > { %s1194_s19 = scalar_lea.vmem %s1193_s23, 32  ;;  %p1195_p13 = scmp.lt.s32.totalorder %s315_s15, %s1193_s23 }
  0x8b   : > { %p1190_p7 = pnand %p1188_p11, %p1499_p1  ;;  %p1196_p0 = scmp.lt.s32.totalorder %s1194_s19, %s1187_s12 }
  0x8d   : > { %p1191_p2 = pneg %p1190_p7  ;;  %p1197_p4 = por %p1196_p0, %p1195_p13 }
  0x8f   : > { %p1198_p8 = pnand %p1197_p4, %p1191_p2 }
  0x91   : > { %1201 = shalt.err (!%p1198_p8)
}
  0x92   : > { %p1815_p9 = scmp.ne.s32.totalorder %s1806_s16, 0  ;;  %s1620_s1 = scalar_lea.hbm %s1781_s4, %s907_s21 }
  0x93   : > { %s347_s14 = scalar_lea.vmem [#allocation11], %s1473_s13  ;;  %s912_s11 = sshll.u32 %s1473_s13, 3 }
  0x94   : > { %1002 = dma.hbm_to_vmem [thread:$0]  (!%p1815_p9), %s312_s17, 16, %s315_s15, %s1493_s7  }
  0x95   : > { %s354_s20 = sshll.u32 %s347_s14, 4  ;;  %s1202_s3 = scalar_lea.hbm %s1620_s1, 16  ;;  %s355_s20 = int_to_ptr.vmem [resolvable:$true] %s354_s20 }
  0x96   : > { %p1203_p4 = scmp.ne.s32.totalorder %s1620_s1, %s1202_s3  ;;  %s1207_s17 = scalar_lea.hbm %s1781_s4, 64 }
  0x97   : > { %p1208_p6 = scmp.lt.u32.totalorder %s1620_s1, %s1781_s4  ;;  %p1209_p10 = scmp.lt.u32.totalorder %s1207_s17, %s1202_s3 }
  0x98   : > { %p1205_p5 = pnand %p1203_p4, %p1499_p1  ;;  %p1211_p11 = scmp.lt.u32.totalorder %s1202_s3, %s1620_s1 }
  0x99   : > { %p1210_p12 = por %p1209_p10, %p1208_p6 }
  0x9a   : > { %p1206_p3 = pneg %p1205_p5 }
  0x9b   : > { %p1212_p7 = por %p1211_p11, %p1210_p12 }
  0x9d   : > { %p1213_p2 = pnand %p1212_p7, %p1206_p3 }
  0x9f   : > { %1216 = shalt.err (!%p1213_p2)
}
  0xa0   : > { %s1217_s18 = scalar_lea.vmem %s355_s20, 16  ;;  %s1364_s23 = smov [#allocation11]  }
  0xa1   : > { %p1218_p13 = scmp.ne.s32.totalorder %s355_s20, %s1217_s18  ;;  %s1222_s19 = sshll.u32 %s1364_s23, 4  ;;  %s1223_s19 = int_to_ptr.vmem [resolvable:$false] %s1222_s19 }
  0xa2   : > { %s1224_s0 = scalar_lea.vmem %s1223_s19, 32  ;;  %p1225_p4 = scmp.lt.s32.totalorder %s355_s20, %s1223_s19 }
  0xa3   : > { %p1220_p0 = pnand %p1218_p13, %p1499_p1  ;;  %p1226_p5 = scmp.lt.s32.totalorder %s1224_s0, %s1217_s18 }
  0xa5   : > { %p1221_p8 = pneg %p1220_p0  ;;  %p1227_p9 = por %p1226_p5, %p1225_p4 }
  0xa7   : > { %p1228_p6 = pnand %p1227_p9, %p1221_p8 }
  0xa9   : > { %1231 = shalt.err (!%p1228_p6)
}
  0xaa   : > { %p1816_p10 = scmp.ne.s32.totalorder %s1806_s16, 0  ;;  %s913_s8 = sshll.u32 %s1352_s25, 7 }
  0xab   : > { %s1646_s7 = scalar_lea.hbm %s1782_s5, %s913_s8  ;;  %s365_s15 = scalar_lea.vmem [#allocation12], %s912_s11 }
  0xac   : > { %1008 = dma.hbm_to_vmem [thread:$0]  (!%p1816_p10), %s1620_s1, 16, %s355_s20, %s1543_s30  }
  0xad   : > { %s373_s17 = sshll.u32 %s365_s15, 4  ;;  %s362_s12 = scalar_lea.sflag [#allocation13], %s1473_s13  ;;  %s374_s17 = int_to_ptr.vmem [resolvable:$true] %s373_s17 }
  0xae   : > { %s1232_s21 = scalar_lea.hbm %s1646_s7, 128  ;;  %s1237_s20 = scalar_lea.hbm %s1782_s5, 512 }
  0xaf   : > { %p1233_p9 = scmp.ne.s32.totalorder %s1646_s7, %s1232_s21  ;;  %p1238_p11 = scmp.lt.u32.totalorder %s1646_s7, %s1782_s5 }
  0xb0   : > { %p1239_p7 = scmp.lt.u32.totalorder %s1237_s20, %s1232_s21  ;;  %p1241_p13 = scmp.lt.u32.totalorder %s1232_s21, %s1646_s7 }
  0xb1   : > { %p1235_p3 = pnand %p1233_p9, %p1499_p1 }
  0xb2   : > { %p1240_p2 = por %p1239_p7, %p1238_p11 }
  0xb3   : > { %p1236_p12 = pneg %p1235_p3 }
  0xb4   : > { %p1242_p0 = por %p1241_p13, %p1240_p2 }
  0xb6   : > { %p1243_p8 = pnand %p1242_p0, %p1236_p12 }
  0xb8   : > { %1246 = shalt.err (!%p1243_p8)
}
  0xb9   : > { %s1247_s13 = scalar_lea.vmem %s374_s17, 128  ;;  %s1365_s11 = smov [#allocation12]  }
  0xba   : > { %p1248_p4 = scmp.ne.s32.totalorder %s374_s17, %s1247_s13  ;;  %s1252_s19 = sshll.u32 %s1365_s11, 4  ;;  %s1253_s19 = int_to_ptr.vmem [resolvable:$false] %s1252_s19 }
  0xbb   : > { %s1254_s0 = scalar_lea.vmem %s1253_s19, 256  ;;  %p1255_p9 = scmp.lt.s32.totalorder %s374_s17, %s1253_s19 }
  0xbc   : > { %p1250_p5 = pnand %p1248_p4, %p1499_p1  ;;  %p1256_p3 = scmp.lt.s32.totalorder %s1254_s0, %s1247_s13 }
  0xbe   : > { %p1251_p6 = pneg %p1250_p5  ;;  %p1257_p10 = por %p1256_p3, %p1255_p9 }
  0xc0   : > { %p1258_p7 = pnand %p1257_p10, %p1251_p6 }
  0xc2   : > { %1261 = shalt.err (!%p1258_p7)
}
  0xc3   : > { %p1817_p11 = scmp.ne.s32.totalorder %s1806_s16, 0  ;;  %p1818_p12 = scmp.ne.s32.totalorder %s1809_s28, 0 }
  0xc4   : > { %s1671_s29 = sand.u32 (!%p1818_p12), 1, %s1340_s22   ;;  %p1819_p1 = scmp.ne.s32.totalorder (!%p1818_p12), %s1801_s9, 0 }
  0xc5   : > { %1011 = dma.hbm_to_vmem [thread:$0]  (!%p1817_p11), %s1646_s7, 128, %s374_s17, %s362_s12  }
  0xc6   : > { %382 = sbr.rel (%p1818_p12) target bundleno = 685 (0x2ad), region = 44  ;;  %s915_s8 = sshll.u32 (!%p1818_p12), %s1671_s29, 2 }
  0xc7   : > { %s385_s14 = scalar_lea.sflag (!%p1818_p12), [#allocation4], %s1671_s29  ;;  %s1677_s3 = scalar_lea.vmem (!%p1818_p12), [#allocation3], %s915_s8 }
  0xcd   : > { %1315 = dma.done.wait (%p1819_p1), %s385_s14, 64  }
  0xce   : > { %1317 = vsyncadd (%p1819_p1), %s385_s14, 4294967232  ;;  %s393_s16 = sand.u32 1, %s1436_s27   ;;  %s916_s28 = sshll.u32 %s1671_s29, 4 }
  0xcf   : > { %s394_s7 = scalar_lea.sflag [#allocation7], %s393_s16  ;;  %s397_s15 = scalar_lea.vmem [#allocation6], %s916_s28 }
  0xd0   : > { %1319 = dma.done.wait (%p1819_p1), %s394_s7, 272  }
  0xd1   : > { %1321 = vsyncadd (%p1819_p1), %s394_s7, 4294967024  ;;  %s917_s17 = sshll.u32 %s1671_s29, 6  ;;  %s405_s12 = scalar_lea.vmem [#allocation8], %s1671_s29 }
  0xd2   : > { %s411_s21 = scalar_lea.sflag [#allocation10], %s393_s16  ;;  %s1691_s30 = scalar_lea.vmem [#allocation9], %s917_s17 }
  0xd3   : > { %1323 = dma.done.wait (%p1819_p1), %s411_s21, 1040  }
  0xd4   : > { %1325 = vsyncadd (%p1819_p1), %s411_s21, 4294966256  ;;  %s918_s27 = sshll.u32 %s1671_s29, 3  ;;  %s422_s1 = scalar_lea.vmem [#allocation11], %s1671_s29 }
  0xd5   : > { %s428_s20 = scalar_lea.sflag [#allocation13], %s1671_s29  ;;  %s1700_s18 = scalar_lea.vmem [#allocation12], %s918_s27 }
  0xd6   : > { %1327 = dma.done.wait (%p1819_p1), %s428_s20, 128  }
  0xd7   : > { %1329 = vsyncadd (%p1819_p1), %s428_s20, 4294967168  ;;  %vm489_vm0 = vcmask 261120   ;;  %v1366_v0 = vmov 0.0   ;;  %vm1367_vm1 = vmmov 0   ;;  %v1072_v1 = vld [vmem:[%s397_s15] sm:$0xff]   ;;  %v1073_v2 = vld [vmem:[%s397_s15 + $0x8] sm:$0xff]  }
  0xd8   : > { %951 = vmatprep.subr.bf16.mxu0 %v1366_v0  ;;  %955 = vmatprep.mubr.msk.bf16.mxu0 %vm1367_vm1, %v1366_v0  ;;  %490 = vst.msk [vmem:[#allocation2] sm:$0xff] %vm489_vm0, %v1366_v0  ;;  %v1074_v3 = vld [vmem:[%s1691_s30] sm:$0xff]   ;;  %v1075_v4 = vld [vmem:[%s1691_s30 + $0x8] sm:$0xff]   ;;  %v491_v5 = vld [vmem:[%s1677_s3] sm:$0xf]  ;;  %v1368_v13 = vmov 0  }
  0xd9   : > { %959 = vmatprep.subr.bf16.mxu1 %v1366_v0  ;;  %975 = vmatprep.mubr.msk.bf16.mxu1 %vm1367_vm1, %v1366_v0  ;;  %v1076_v6 = vld [vmem:[%s1691_s30 + $0x10] sm:$0xff]   ;;  %v1077_v7 = vld [vmem:[%s1691_s30 + $0x18] sm:$0xff]   ;;  %v1078_v8 = vld [vmem:[%s1691_s30 + $0x20] sm:$0xff]   ;;  %s934_s9 = sshll.u32 %s1348_s24, 6  ;;  %s482_s23 = scalar_lea.vmem [#allocation14], %s915_s8  ;;  %vm688_vm2 = vcmask 257024  }
  0xda   : > { %952 = vmatpush3.bf16.msra.mxu0 %v1072_v1  ;;  %960 = vmatpush3.bf16.msra.mxu1 %v1074_v3  ;;  %v1079_v9 = vld [vmem:[%s1691_s30 + $0x28] sm:$0xff]   ;;  %v1080_v10 = vld [vmem:[%s1691_s30 + $0x30] sm:$0xff]   ;;  %v1081_v11 = vld [vmem:[%s1691_s30 + $0x38] sm:$0xff]   ;;  %s705_s13 = sshll.u32 %s482_s23, 4  ;;  %s1729_s0 = scalar_lea.hbm %s1783_s6, %s934_s9  ;;  %s1731_s13 = int_to_ptr.vmem [resolvable:$true] %s705_s13 }
  0xdb   : > { %953 = vmatprep.subr.bf16.mxu0 %v1366_v0  ;;  %961 = vmatprep.subr.bf16.mxu1 %v1366_v0  ;;  %v680_v12 = vld [vmem:[%s1700_s18] sm:$0xff]  ;;  %s691_s14 = scalar_lea.sflag [#allocation5], %s1671_s29  ;;  %s1262_s3 = scalar_lea.vmem %s1731_s13, 64 }
  0xdc   : > { %1071 = vset.pattern.permute.xlu0 %v1368_v13  ;;  %v920_v14 = vld [vmem:[%s405_s12] ss:$0 sm:$0xff]  ;;  %p1263_p10 = scmp.ne.s32.totalorder %s1731_s13, %s1262_s3  ;;  %p1820_p2 = scmp.ne.s32.totalorder %s1802_s10, 0 }
  0xdd   : > { %683 = vperm.xlu0 %1071, %v680_v12   ;;  %v932_v28 = vld [vmem:[%s422_s1] ss:$0 sm:$0xff]  ;;  %s1369_s24 = smov [#allocation14]  }
  0xde   : > { %954 = vmatpush3.bf16.msra.mxu0 %v1073_v2  ;;  %962 = vmatpush3.bf16.msra.mxu1 %v1075_v4  ;;  %p1264_p13 = pnand %p1263_p10, %p1820_p2  ;;  %s1266_s8 = sshll.u32 %s1369_s24, 4  ;;  %s1267_s8 = int_to_ptr.vmem [resolvable:$false] %s1266_s8 }
  0xdf   : > { %963 = vmatprep.subr.bf16.mxu1 %v1366_v0  ;;  %v560_v22 = vld [vmem:[#allocation2] sm:$0xff]  ;;  %s1268_s16 = scalar_lea.vmem %s1267_s8, 128  ;;  %p1269_p8 = scmp.lt.s32.totalorder %s1731_s13, %s1267_s8 }
  0xe0   : > { %p1265_p0 = pneg %p1264_p13  ;;  %p1270_p4 = scmp.lt.s32.totalorder %s1268_s16, %s1262_s3 }
  0xe1   : > { %956 = vmatmul.mubr.msk.bf16.vlgmr.msra.gmra.mrb[0].mxu0 %vm489_vm0, %v491_v5 }
  0xe2   : > { %964 = vmatpush3.bf16.msra.mxu1 %v1076_v6  ;;  %p1271_p5 = por %p1270_p4, %p1269_p8 }
  0xe3   : > { %965 = vmatprep.subr.bf16.mxu1 %v1366_v0 }
  0xe4   : > { %p1272_p6 = pnand %p1271_p5, %p1265_p0 }
  0xe6   : > { %966 = vmatpush3.bf16.msra.mxu1 %v1077_v7 }
  0xe7   : > { %967 = vmatprep.subr.bf16.mxu1 %v1366_v0 }
  0xea   : > { %968 = vmatpush3.bf16.msra.mxu1 %v1078_v8 }
  0xeb   : > { %969 = vmatprep.subr.bf16.mxu1 %v1366_v0 }
  0xee   : > { %970 = vmatpush3.bf16.msra.mxu1 %v1079_v9 }
  0xef   : > { %971 = vmatprep.subr.bf16.mxu1 %v1366_v0 }
  0xf2   : > { %972 = vmatpush3.bf16.msra.mxu1 %v1080_v10 }
  0xf3   : > { %973 = vmatprep.subr.bf16.mxu1 %v1366_v0 }
  0xf6   : > { %974 = vmatpush3.bf16.msra.mxu1 %v1081_v11 }
 0x15c   : > { %v684_v29 = vpop.permute.xlu0 %683 }
 0x1b4   : > { %v553_v15 = vpop.f32.mrb[0].mxu0 }
 0x1b5   : > { %v554_v16 = vadd.f32 %v920_v14, %v553_v15  ;;  %v957_v17 = vpop.f32.mrb[1].mxu0 }
 0x1b6   : > { %v556_v18 = vpop.f32.mrb[2].mxu0 }
 0x1b7   : > { %v559_v19 = vmax.f32 %v554_v16, 0.0  ;;  %v958_v20 = vpop.f32.mrb[3].mxu0 }
 0x1b9   : > { %v561_v21 = vpack.c.bf16 %v559_v19, %v559_v19 }
 0x1bb   : > { %976 = vmatmul.mubr.bf16.vlgmr.msra.gmra.mrb[0].mxu1 %v561_v21 }
 0x28e   : > { %v660_v23 = vpop.f32.mrb[0].mxu1 }
 0x28f   : > { %v666_v24 = vadd.f32 %v660_v23, %v560_v22  ;;  %v977_v25 = vpop.f32.mrb[1].mxu1 }
 0x290   : > { %v663_v26 = vpop.f32.mrb[2].mxu1 }
 0x291   : > { %667 = vst.msk [vmem:[#allocation2] sm:$0xff] %vm489_vm0, %v666_v24  ;;  %v978_v27 = vpop.f32.mrb[3].mxu1 }
 0x298   : > { %v671_v30 = vld [vmem:[#allocation2] sm:$0xff] }
 0x299   : > { %v679_v31 = vadd.f32 %v932_v28, %v671_v30 }
 0x29b   : > { %v686_v32 = vmul.f32 %v684_v29, %v679_v31 }
 0x29d   : > { %v687_v33 = vpack.c.bf16 %v686_v32, %v686_v32 }
 0x29f   : > { %689 = vst.msk [vmem:[%s482_s23] sm:$0xf] %vm688_vm2, %v687_v33 }
 0x2a0   : > { %1275 = shalt.err (!%p1272_p6)
}
 0x2a1   : > { %s1276_s29 = scalar_lea.hbm %s1729_s0, 64  ;;  %s1280_s15 = scalar_lea.hbm %s1783_s6, 256 }
 0x2a2   : > { %p1277_p9 = scmp.ne.s32.totalorder %s1729_s0, %s1276_s29  ;;  %p1281_p11 = scmp.lt.u32.totalorder %s1729_s0, %s1783_s6 }
 0x2a3   : > { %p1282_p12 = scmp.lt.u32.totalorder %s1280_s15, %s1276_s29  ;;  %p1284_p10 = scmp.lt.u32.totalorder %s1276_s29, %s1729_s0 }
 0x2a4   : > { %p1278_p3 = pnand %p1277_p9, %p1820_p2 }
 0x2a5   : > { %p1283_p1 = por %p1282_p12, %p1281_p11 }
 0x2a6   : > { %p1279_p7 = pneg %p1278_p3 }
 0x2a7   : > { %p1285_p13 = por %p1284_p10, %p1283_p1 }
 0x2a9   : > { %p1286_p0 = pnand %p1285_p13, %p1279_p7 }
 0x2ab   : > { %1289 = shalt.err (!%p1286_p0)
}
 0x2ac   : > { %991 = dma.vmem_to_hbm [thread:$0]  (%p1820_p2), %s1731_s13, 64, %s1729_s0, %s691_s14  }
 0x2ad PF: > { %s1821_s21 = sld [smem:[#allocation20_spill]]  ;;  %s1822_s30 = sld [smem:[#allocation24_spill]] }
 0x2ae   : > { %p1017_p8 = scmp.ge.s32.totalorder %s1356_s26, 2 }
 0x2b3   : > { %s717_s27 = sand.u32 1, %s1821_s21   ;;  %p1823_p4 = scmp.ne.s32.totalorder %s1822_s30, 0 }
 0x2b4   : > { %s718_s1 = scalar_lea.sflag [#allocation5], %s717_s27 }
 0x2b5   : > { %p1013_p5 = pnand %p1017_p8, %p1823_p4 }
 0x2b7   : > { %1331 = dma.done.wait (!%p1013_p5), %s718_s1, 64  }
 0x2b8   : > { %1333 = vsyncadd (!%p1013_p5), %s718_s1, 4294967232  ;;  %s31_s26 = sadd.s32 1, %s1356_s26   ;;  %s1824_s20 = sld [smem:[#allocation21_spill]] }
 0x2b9   : > { %p28_p6 = scmp.ge.s32.totalorder %s31_s26, 6   ;;  %s1825_s23 = sld [smem:[#allocation23_spill]] }
 0x2ba   : > { %s1826_s10 = sld [smem:[#allocation22_spill]]  ;;  %s1827_s21 = smov %s1340_s22 }
 0x2bb   : > { %s1829_s24 = smov %s1352_s25  ;;  %30 = sbr.rel (!%p28_p6) target bundleno = 16 (0x10), region = 158 }
 0x2be   : > { %s1828_s22 = smov %s1824_s20 }
 0x2c0   : > { %s1830_s25 = smov %s1826_s10 }
 0x2c2   :  { %723 = vsyncpa [#allocation4], 1 }
 0x2c3   :  { %725 = vsyncpa [#allocation4 + $0x1], 1 }
 0x2c4   :  { %726 = vsyncpa [#allocation7], 1 }
 0x2c5   :  { %728 = vsyncpa [#allocation7 + $0x1], 1 }
 0x2c6   :  { %729 = vsyncpa [#allocation10], 1 }
 0x2c7   :  { %731 = vsyncpa [#allocation10 + $0x1], 1 }
 0x2c8   :  { %732 = vsyncpa [#allocation13], 1 }
 0x2c9   :  { %734 = vsyncpa [#allocation13 + $0x1], 1 }
 0x2ca   :  { %735 = vsyncpa [#allocation5], 1 }
 0x2cb   :  { %737 = vsyncpa [#allocation5 + $0x1], 1 }

</bundles_post_ra>
